<compile_context>
chip_gen: v5e
topology: v5e:2x2
jax: 0.10.0
libtpu: 0.0.40
codegen_flags: <defaults>
</compile_context>

<pallas_src>
import jax
import jax.numpy as jnp
from jax.experimental import pallas as pl
from jax.experimental.pallas import tpu as pltpu

_K = 4            # all convs in the module are 4x4
_KK = _K * _K
_C3 = 100         # final Conv2d output channels (module spec literal)
_C3_PAD = 128     # padded to a full lane width for a dense final store


# ----------------------------- fused Pallas kernel -----------------------------

def _netrs_fused_kernel(p1_ref, w1_ref, w2_ref, w3_ref, bn_ref, o_ref,
                        pb_ref, p2_ref, p3_ref):
    f32 = jnp.float32
    n = o_ref.shape[0]          # batch
    c1 = w1_ref.shape[1]        # ndf // 4
    c2 = w2_ref.shape[1]        # ndf // 8
    q = _K                      # layer-2 output is 4x4 (16x16 input), 4 slots/phase

    # ---- Conv2d(nc, ndf//4, 4, 2, 1) + LeakyReLU(0.2): one MXU push ---------
    # p1 rows are phase-major (h1%2, w1%2, h1//2, w1//2, n); cols (kh, kw, cin).
    y1 = jnp.dot(p1_ref[...], w1_ref[...], preferred_element_type=f32)  # (4*q*q*n, C1)
    y1 = jnp.where(y1 > 0, y1, 0.2 * y1)

    # ---- Scatter y1 into a zero-padded phase buffer --------------------------
    # pb[rh*2+rw, sh, sw*n + b, :] holds y1 at (b, h1, w1) with h1 = 2*sh - rh,
    # w1 = 2*sw - rw.  The extra slot per axis (slot 0 of odd phases, slot q of
    # even phases) stays zero and implements the conv-2 "pad=1" ring, so every
    # stride-2 conv tap below is a contiguous static slice.
    pb_ref[...] = jnp.zeros_like(pb_ref)
    for rh in range(2):
        for rw in range(2):
            ph = rh * 2 + rw
            for qh in range(q):
                src = y1[(ph * q + qh) * q * n:(ph * q + qh + 1) * q * n, :]
                pb_ref[ph, qh + rh, rw * n:(rw + q) * n, :] = src

    # ---- Conv2d(ndf//4, ndf//8, 4, 2, 1): one (M2, 16*C1) x (16*C1, C2) push -
    for kh in range(_K):
        for kw in range(_K):
            ph = ((kh + 1) % 2) * 2 + ((kw + 1) % 2)
            ah, aw = kh // 2, kw // 2
            col = (kh * _K + kw) * c1
            for i in range(q):                                   # i = output row oh2
                blk = pb_ref[ph, ah + i, aw * n:(aw + q) * n, :]  # (q*n, C1)
                p2_ref[i * q * n:(i + 1) * q * n, col:col + c1] = blk
    z2 = jnp.dot(p2_ref[...], w2_ref[...], preferred_element_type=f32)  # (M2, C2)

    # ---- BatchNorm2d (training-mode batch stats, biased var) + LeakyReLU(0.2)
    # TODO(synk): eval-mode BatchNorm (running_mean/var tracking) not modeled;
    #             this reproduces the PyTorch module's training-mode forward.
    mean = jnp.mean(z2, axis=0, keepdims=True)
    var = jnp.mean(jnp.square(z2 - mean), axis=0, keepdims=True)
    y2 = (z2 - mean) * jax.lax.rsqrt(var + 1e-5) * bn_ref[0:1, :] + bn_ref[1:2, :]
    y2 = jnp.where(y2 > 0, y2, 0.2 * y2)            # rows ordered (h2, w2, n)

    # ---- Conv2d(ndf//8, 100, 4, 1, 0): the whole 4x4 map is ONE patch -> 1 push
    # (a 16x16 input leaves exactly one valid 4x4 window for the final conv).
    for p in range(q * q):
        p3_ref[:, p * c2:(p + 1) * c2] = y2[p * n:(p + 1) * n, :]
    o_ref[...] = jnp.dot(p3_ref[...], w3_ref[...],
                         preferred_element_type=f32)             # (N, 128) lane-dense


# ----------------------------- wrapper / glue -----------------------------

def _conv_out(h, k, s, p):
    return (h + 2 * p - k) // s + 1


def _full_spec(shape):
    # single full-array block, resident in VMEM
    return pl.BlockSpec(shape, lambda i: (0,) * len(shape))


def init_params(key, nc, ndf):
    """Weights pre-flattened/transposed/padded ONCE into the layouts the fused
    kernel consumes (never reshaped per forward)."""
    c1, c2 = ndf // 4, ndf // 8
    k1, k2, k3 = jax.random.split(key, 3)
    # PyTorch-layout conv weights (Cout, Cin, kh, kw), bias=False everywhere.
    w1 = 0.02 * jax.random.normal(k1, (c1, nc, _K, _K), jnp.float32)
    w2 = 0.02 * jax.random.normal(k2, (c2, c1, _K, _K), jnp.float32)
    w3 = 0.02 * jax.random.normal(k3, (_C3, c2, _K, _K), jnp.float32)
    w3p = jnp.pad(w3, ((0, _C3_PAD - _C3), (0, 0), (0, 0), (0, 0)))  # zero channels
    return {
        "w1f": w1.transpose(2, 3, 1, 0).reshape(_KK * nc, c1),   # (kh,kw,cin) x cout
        "w2f": w2.transpose(2, 3, 1, 0).reshape(_KK * c1, c2),   # (kh,kw,cin) x cout
        "w3f": w3p.transpose(2, 3, 1, 0).reshape(_KK * c2, _C3_PAD),
        # BatchNorm2d defaults (gamma=1 row 0, beta=0 row 1) in ONE buffer.
        "bn2": jnp.concatenate([jnp.ones((1, c2), jnp.float32),
                                jnp.zeros((1, c2), jnp.float32)], axis=0),
    }


def net_rs_forward(x, params):
    """x: (N, nc, 16, 16) NCHW -> (N, 100, 1, 1) NCHW (training-mode BatchNorm)."""
    w1f, w2f, w3f, bn2 = params["w1f"], params["w2f"], params["w3f"], params["bn2"]
    n, nc, h, w = x.shape
    c1, c2 = w1f.shape[1], w2f.shape[1]

    ht1, wd1 = _conv_out(h, _K, 2, 1), _conv_out(w, _K, 2, 1)
    ht2, wd2 = _conv_out(ht1, _K, 2, 1), _conv_out(wd1, _K, 2, 1)
    ht3, wd3 = _conv_out(ht2, _K, 1, 0), _conv_out(wd2, _K, 1, 0)
    # The fused kernel's phase-split layer-2 gather and single-patch layer-3
    # matmul are specialized to the 16x16 -> 8x8 -> 4x4 -> 1x1 pipeline.
    assert (ht1, wd1, ht2, wd2, ht3, wd3) == (8, 8, 4, 4, 1, 1), \
        "fused _netRS kernel requires 16x16 spatial input"
    m1, m2 = n * ht1 * wd1, n * ht2 * wd2

    # Layer-1 im2col in the wrapper (16 strided XLA slices + one stack), rows
    # permuted to phase-major (h1%2, w1%2, h1//2, w1//2, n); cols (kh, kw, cin).
    xp = jnp.pad(jnp.transpose(x, (0, 2, 3, 1)), ((0, 0), (1, 1), (1, 1), (0, 0)))
    views = [xp[:, kh:kh + 2 * ht1 - 1:2, kw:kw + 2 * wd1 - 1:2, :]
             for kh in range(_K) for kw in range(_K)]
    pat = jnp.stack(views, axis=3).reshape(n, ht1, wd1, _KK * nc)
    pat = pat.reshape(n, ht1 // 2, 2, wd1 // 2, 2, _KK * nc)
    p1 = pat.transpose(2, 4, 1, 3, 0, 5).reshape(m1, _KK * nc)

    inputs = [p1, w1f, w2f, w3f, bn2]
    flops = 2 * (m1 * _KK * nc * c1 + m2 * _KK * c1 * c2 + n * _KK * c2 * _C3_PAD)
    bytes_accessed = 4 * (sum(int(a.size) for a in inputs) + n * _C3_PAD)

    out = pl.pallas_call(
        _netrs_fused_kernel,
        out_shape=jax.ShapeDtypeStruct((n, _C3_PAD), jnp.float32),
        grid=(1,),
        in_specs=[_full_spec(a.shape) for a in inputs],
        out_specs=_full_spec((n, _C3_PAD)),
        scratch_shapes=[
            pltpu.VMEM((4, ht2 + 1, (wd2 + 1) * n, c1), jnp.float32),  # phase buffer
            pltpu.VMEM((m2, _KK * c1), jnp.float32),                   # layer-2 patches
            pltpu.VMEM((n, ht2 * wd2 * c2), jnp.float32),              # layer-3 patch
        ],
        compiler_params=pltpu.CompilerParams(dimension_semantics=("arbitrary",)),
        cost_estimate=pl.CostEstimate(flops=flops, transcendentals=c2,
                                      bytes_accessed=bytes_accessed),
    )(*inputs)

    # lane-dense (N, 128) -> drop padded channels once -> NCHW module output
    return out[:, :_C3].reshape(n, _C3, 1, 1)


if __name__ == "__main__":
    key = jax.random.PRNGKey(0)
    kx, kp = jax.random.split(key)

    nc, ndf = 4, 32            # ndf//4 = 8, ndf//8 = 4
    x = jax.random.normal(kx, (2, nc, 16, 16), jnp.float32)   # NCHW, 16x16 -> 1x1 out
    params = init_params(kp, nc, ndf)

    out = jax.jit(net_rs_forward)(x, params)
    out = jax.block_until_ready(out)
    assert out.shape == (2, 100, 1, 1), out.shape
    print("KERNEL_OK")
</pallas_src>

<mosaic_0001>
module attributes {stable_mosaic.version = 11 : i64} {
  func.func @_netrs_fused_kernel(%arg0: i32, %arg1: memref<128x64xf32, #tpu.memory_space<vmem>>, %arg2: memref<64x8xf32, #tpu.memory_space<vmem>>, %arg3: memref<128x4xf32, #tpu.memory_space<vmem>>, %arg4: memref<64x128xf32, #tpu.memory_space<vmem>>, %arg5: memref<2x4xf32, #tpu.memory_space<vmem>>, %arg6: memref<2x128xf32, #tpu.memory_space<vmem>>, %arg7: memref<4x5x10x8xf32, #tpu.memory_space<vmem>>, %arg8: memref<32x128xf32, #tpu.memory_space<vmem>>, %arg9: memref<2x64xf32, #tpu.memory_space<vmem>>) attributes {dimension_semantics = [#tpu.dimension_semantics<arbitrary>], iteration_bounds = array<i64: 1>, scalar_prefetch = 0 : i64, scratch_operands = 3 : i64, tpu.core_type = #tpu.core_type<tc>, window_params = [{pipeline_mode = #tpu.pipeline_mode<synchronous>, transform_indices = @transform_0, window_bounds = array<i64: 128, 64>}, {pipeline_mode = #tpu.pipeline_mode<synchronous>, transform_indices = @transform_1, window_bounds = array<i64: 64, 8>}, {pipeline_mode = #tpu.pipeline_mode<synchronous>, transform_indices = @transform_2, window_bounds = array<i64: 128, 4>}, {pipeline_mode = #tpu.pipeline_mode<synchronous>, transform_indices = @transform_3, window_bounds = array<i64: 64, 128>}, {pipeline_mode = #tpu.pipeline_mode<synchronous>, transform_indices = @transform_4, window_bounds = array<i64: 2, 4>}, {pipeline_mode = #tpu.pipeline_mode<synchronous>, transform_indices = @transform_5, window_bounds = array<i64: 2, 128>}]} {
    %c0 = arith.constant 0 : index
    %c0_0 = arith.constant 0 : index
    %0 = vector.load %arg1[%c0, %c0_0] : memref<128x64xf32, #tpu.memory_space<vmem>>, vector<128x64xf32>
    %c0_1 = arith.constant 0 : index
    %c0_2 = arith.constant 0 : index
    %1 = vector.load %arg2[%c0_1, %c0_2] : memref<64x8xf32, #tpu.memory_space<vmem>>, vector<64x8xf32>
    %cst = arith.constant dense<0.000000e+00> : vector<128x8xf32>
    %2 = tpu.matmul %0, %1, %cst {dimension_numbers = #tpu.dot_dimension_numbers<[1], [0], [0], [1], [0, 0, 1, 1], [], []>} : vector<128x64xf32>, vector<64x8xf32>, vector<128x8xf32> -> vector<128x8xf32>
    %cst_3 = arith.constant 0.000000e+00 : f32
    %3 = vector.broadcast %cst_3 : f32 to vector<128x8xf32>
    %4 = arith.cmpf ogt, %2, %3 : vector<128x8xf32>
    %cst_4 = arith.constant 2.000000e-01 : f32
    %5 = vector.broadcast %cst_4 : f32 to vector<128x8xf32>
    %6 = arith.mulf %5, %2 : vector<128x8xf32>
    %7 = arith.select %4, %2, %6 : vector<128x8xi1>, vector<128x8xf32>
    %cst_5 = arith.constant 0.000000e+00 : f32
    %8 = vector.broadcast %cst_5 : f32 to vector<4x5x10x8xf32>
    %c0_6 = arith.constant 0 : index
    %c0_7 = arith.constant 0 : index
    %c0_8 = arith.constant 0 : index
    %c0_9 = arith.constant 0 : index
    %9 = vector.load %arg7[%c0_6, %c0_7, %c0_8, %c0_9] : memref<4x5x10x8xf32, #tpu.memory_space<vmem>>, vector<4x5x10x8xf32>
    tpu.vector_store %arg7[%c0_6, %c0_7, %c0_8, %c0_9], %8 {strides = array<i32>} : memref<4x5x10x8xf32, #tpu.memory_space<vmem>>, vector<4x5x10x8xf32>,
    %10 = vector.extract_strided_slice %7 {offsets = [0, 0], sizes = [8, 8], strides = [1, 1]} : vector<128x8xf32> to vector<8x8xf32>
    %c0_10 = arith.constant 0 : index
    %c0_11 = arith.constant 0 : index
    %c0_12 = arith.constant 0 : index
    %c0_13 = arith.constant 0 : index
    %11 = vector.load %arg7[%c0_10, %c0_11, %c0_12, %c0_13] : memref<4x5x10x8xf32, #tpu.memory_space<vmem>>, vector<1x1x8x8xf32>
    %12 = vector.shape_cast %11 : vector<1x1x8x8xf32> to vector<8x8xf32>
    %13 = vector.shape_cast %10 : vector<8x8xf32> to vector<1x1x8x8xf32>
    tpu.vector_store %arg7[%c0_10, %c0_11, %c0_12, %c0_13], %13 {strides = array<i32>} : memref<4x5x10x8xf32, #tpu.memory_space<vmem>>, vector<1x1x8x8xf32>,
    %14 = vector.extract_strided_slice %7 {offsets = [8, 0], sizes = [8, 8], strides = [1, 1]} : vector<128x8xf32> to vector<8x8xf32>
    %c0_14 = arith.constant 0 : index
    %c1 = arith.constant 1 : index
    %c0_15 = arith.constant 0 : index
    %c0_16 = arith.constant 0 : index
    %15 = vector.load %arg7[%c0_14, %c1, %c0_15, %c0_16] : memref<4x5x10x8xf32, #tpu.memory_space<vmem>>, vector<1x1x8x8xf32>
    %16 = vector.shape_cast %15 : vector<1x1x8x8xf32> to vector<8x8xf32>
    %17 = vector.shape_cast %14 : vector<8x8xf32> to vector<1x1x8x8xf32>
    tpu.vector_store %arg7[%c0_14, %c1, %c0_15, %c0_16], %17 {strides = array<i32>} : memref<4x5x10x8xf32, #tpu.memory_space<vmem>>, vector<1x1x8x8xf32>,
    %18 = vector.extract_strided_slice %7 {offsets = [16, 0], sizes = [8, 8], strides = [1, 1]} : vector<128x8xf32> to vector<8x8xf32>
    %c0_17 = arith.constant 0 : index
    %c2 = arith.constant 2 : index
    %c0_18 = arith.constant 0 : index
    %c0_19 = arith.constant 0 : index
    %19 = vector.load %arg7[%c0_17, %c2, %c0_18, %c0_19] : memref<4x5x10x8xf32, #tpu.memory_space<vmem>>, vector<1x1x8x8xf32>
    %20 = vector.shape_cast %19 : vector<1x1x8x8xf32> to vector<8x8xf32>
    %21 = vector.shape_cast %18 : vector<8x8xf32> to vector<1x1x8x8xf32>
    tpu.vector_store %arg7[%c0_17, %c2, %c0_18, %c0_19], %21 {strides = array<i32>} : memref<4x5x10x8xf32, #tpu.memory_space<vmem>>, vector<1x1x8x8xf32>,
    %22 = vector.extract_strided_slice %7 {offsets = [24, 0], sizes = [8, 8], strides = [1, 1]} : vector<128x8xf32> to vector<8x8xf32>
    %c0_20 = arith.constant 0 : index
    %c3 = arith.constant 3 : index
    %c0_21 = arith.constant 0 : index
    %c0_22 = arith.constant 0 : index
    %23 = vector.load %arg7[%c0_20, %c3, %c0_21, %c0_22] : memref<4x5x10x8xf32, #tpu.memory_space<vmem>>, vector<1x1x8x8xf32>
    %24 = vector.shape_cast %23 : vector<1x1x8x8xf32> to vector<8x8xf32>
    %25 = vector.shape_cast %22 : vector<8x8xf32> to vector<1x1x8x8xf32>
    tpu.vector_store %arg7[%c0_20, %c3, %c0_21, %c0_22], %25 {strides = array<i32>} : memref<4x5x10x8xf32, #tpu.memory_space<vmem>>, vector<1x1x8x8xf32>,
    %26 = vector.extract_strided_slice %7 {offsets = [32, 0], sizes = [8, 8], strides = [1, 1]} : vector<128x8xf32> to vector<8x8xf32>
    %c1_23 = arith.constant 1 : index
    %c0_24 = arith.constant 0 : index
    %c2_25 = arith.constant 2 : index
    %c0_26 = arith.constant 0 : index
    %27 = vector.load %arg7[%c1_23, %c0_24, %c2_25, %c0_26] : memref<4x5x10x8xf32, #tpu.memory_space<vmem>>, vector<1x1x8x8xf32>
    %28 = vector.shape_cast %27 : vector<1x1x8x8xf32> to vector<8x8xf32>
    %29 = vector.shape_cast %26 : vector<8x8xf32> to vector<1x1x8x8xf32>
    tpu.vector_store %arg7[%c1_23, %c0_24, %c2_25, %c0_26], %29 {strides = array<i32>} : memref<4x5x10x8xf32, #tpu.memory_space<vmem>>, vector<1x1x8x8xf32>,
    %30 = vector.extract_strided_slice %7 {offsets = [40, 0], sizes = [8, 8], strides = [1, 1]} : vector<128x8xf32> to vector<8x8xf32>
    %c1_27 = arith.constant 1 : index
    %c1_28 = arith.constant 1 : index
    %c2_29 = arith.constant 2 : index
    %c0_30 = arith.constant 0 : index
    %31 = vector.load %arg7[%c1_27, %c1_28, %c2_29, %c0_30] : memref<4x5x10x8xf32, #tpu.memory_space<vmem>>, vector<1x1x8x8xf32>
    %32 = vector.shape_cast %31 : vector<1x1x8x8xf32> to vector<8x8xf32>
    %33 = vector.shape_cast %30 : vector<8x8xf32> to vector<1x1x8x8xf32>
    tpu.vector_store %arg7[%c1_27, %c1_28, %c2_29, %c0_30], %33 {strides = array<i32>} : memref<4x5x10x8xf32, #tpu.memory_space<vmem>>, vector<1x1x8x8xf32>,
    %34 = vector.extract_strided_slice %7 {offsets = [48, 0], sizes = [8, 8], strides = [1, 1]} : vector<128x8xf32> to vector<8x8xf32>
    %c1_31 = arith.constant 1 : index
    %c2_32 = arith.constant 2 : index
    %c2_33 = arith.constant 2 : index
    %c0_34 = arith.constant 0 : index
    %35 = vector.load %arg7[%c1_31, %c2_32, %c2_33, %c0_34] : memref<4x5x10x8xf32, #tpu.memory_space<vmem>>, vector<1x1x8x8xf32>
    %36 = vector.shape_cast %35 : vector<1x1x8x8xf32> to vector<8x8xf32>
    %37 = vector.shape_cast %34 : vector<8x8xf32> to vector<1x1x8x8xf32>
    tpu.vector_store %arg7[%c1_31, %c2_32, %c2_33, %c0_34], %37 {strides = array<i32>} : memref<4x5x10x8xf32, #tpu.memory_space<vmem>>, vector<1x1x8x8xf32>,
    %38 = vector.extract_strided_slice %7 {offsets = [56, 0], sizes = [8, 8], strides = [1, 1]} : vector<128x8xf32> to vector<8x8xf32>
    %c1_35 = arith.constant 1 : index
    %c3_36 = arith.constant 3 : index
    %c2_37 = arith.constant 2 : index
    %c0_38 = arith.constant 0 : index
    %39 = vector.load %arg7[%c1_35, %c3_36, %c2_37, %c0_38] : memref<4x5x10x8xf32, #tpu.memory_space<vmem>>, vector<1x1x8x8xf32>
    %40 = vector.shape_cast %39 : vector<1x1x8x8xf32> to vector<8x8xf32>
    %41 = vector.shape_cast %38 : vector<8x8xf32> to vector<1x1x8x8xf32>
    tpu.vector_store %arg7[%c1_35, %c3_36, %c2_37, %c0_38], %41 {strides = array<i32>} : memref<4x5x10x8xf32, #tpu.memory_space<vmem>>, vector<1x1x8x8xf32>,
    %42 = vector.extract_strided_slice %7 {offsets = [64, 0], sizes = [8, 8], strides = [1, 1]} : vector<128x8xf32> to vector<8x8xf32>
    %c2_39 = arith.constant 2 : index
    %c1_40 = arith.constant 1 : index
    %c0_41 = arith.constant 0 : index
    %c0_42 = arith.constant 0 : index
    %43 = vector.load %arg7[%c2_39, %c1_40, %c0_41, %c0_42] : memref<4x5x10x8xf32, #tpu.memory_space<vmem>>, vector<1x1x8x8xf32>
    %44 = vector.shape_cast %43 : vector<1x1x8x8xf32> to vector<8x8xf32>
    %45 = vector.shape_cast %42 : vector<8x8xf32> to vector<1x1x8x8xf32>
    tpu.vector_store %arg7[%c2_39, %c1_40, %c0_41, %c0_42], %45 {strides = array<i32>} : memref<4x5x10x8xf32, #tpu.memory_space<vmem>>, vector<1x1x8x8xf32>,
    %46 = vector.extract_strided_slice %7 {offsets = [72, 0], sizes = [8, 8], strides = [1, 1]} : vector<128x8xf32> to vector<8x8xf32>
    %c2_43 = arith.constant 2 : index
    %c2_44 = arith.constant 2 : index
    %c0_45 = arith.constant 0 : index
    %c0_46 = arith.constant 0 : index
    %47 = vector.load %arg7[%c2_43, %c2_44, %c0_45, %c0_46] : memref<4x5x10x8xf32, #tpu.memory_space<vmem>>, vector<1x1x8x8xf32>
    %48 = vector.shape_cast %47 : vector<1x1x8x8xf32> to vector<8x8xf32>
    %49 = vector.shape_cast %46 : vector<8x8xf32> to vector<1x1x8x8xf32>
    tpu.vector_store %arg7[%c2_43, %c2_44, %c0_45, %c0_46], %49 {strides = array<i32>} : memref<4x5x10x8xf32, #tpu.memory_space<vmem>>, vector<1x1x8x8xf32>,
    %50 = vector.extract_strided_slice %7 {offsets = [80, 0], sizes = [8, 8], strides = [1, 1]} : vector<128x8xf32> to vector<8x8xf32>
    %c2_47 = arith.constant 2 : index
    %c3_48 = arith.constant 3 : index
    %c0_49 = arith.constant 0 : index
    %c0_50 = arith.constant 0 : index
    %51 = vector.load %arg7[%c2_47, %c3_48, %c0_49, %c0_50] : memref<4x5x10x8xf32, #tpu.memory_space<vmem>>, vector<1x1x8x8xf32>
    %52 = vector.shape_cast %51 : vector<1x1x8x8xf32> to vector<8x8xf32>
    %53 = vector.shape_cast %50 : vector<8x8xf32> to vector<1x1x8x8xf32>
    tpu.vector_store %arg7[%c2_47, %c3_48, %c0_49, %c0_50], %53 {strides = array<i32>} : memref<4x5x10x8xf32, #tpu.memory_space<vmem>>, vector<1x1x8x8xf32>,
    %54 = vector.extract_strided_slice %7 {offsets = [88, 0], sizes = [8, 8], strides = [1, 1]} : vector<128x8xf32> to vector<8x8xf32>
    %c2_51 = arith.constant 2 : index
    %c4 = arith.constant 4 : index
    %c0_52 = arith.constant 0 : index
    %c0_53 = arith.constant 0 : index
    %55 = vector.load %arg7[%c2_51, %c4, %c0_52, %c0_53] : memref<4x5x10x8xf32, #tpu.memory_space<vmem>>, vector<1x1x8x8xf32>
    %56 = vector.shape_cast %55 : vector<1x1x8x8xf32> to vector<8x8xf32>
    %57 = vector.shape_cast %54 : vector<8x8xf32> to vector<1x1x8x8xf32>
    tpu.vector_store %arg7[%c2_51, %c4, %c0_52, %c0_53], %57 {strides = array<i32>} : memref<4x5x10x8xf32, #tpu.memory_space<vmem>>, vector<1x1x8x8xf32>,
    %58 = vector.extract_strided_slice %7 {offsets = [96, 0], sizes = [8, 8], strides = [1, 1]} : vector<128x8xf32> to vector<8x8xf32>
    %c3_54 = arith.constant 3 : index
    %c1_55 = arith.constant 1 : index
    %c2_56 = arith.constant 2 : index
    %c0_57 = arith.constant 0 : index
    %59 = vector.load %arg7[%c3_54, %c1_55, %c2_56, %c0_57] : memref<4x5x10x8xf32, #tpu.memory_space<vmem>>, vector<1x1x8x8xf32>
    %60 = vector.shape_cast %59 : vector<1x1x8x8xf32> to vector<8x8xf32>
    %61 = vector.shape_cast %58 : vector<8x8xf32> to vector<1x1x8x8xf32>
    tpu.vector_store %arg7[%c3_54, %c1_55, %c2_56, %c0_57], %61 {strides = array<i32>} : memref<4x5x10x8xf32, #tpu.memory_space<vmem>>, vector<1x1x8x8xf32>,
    %62 = vector.extract_strided_slice %7 {offsets = [104, 0], sizes = [8, 8], strides = [1, 1]} : vector<128x8xf32> to vector<8x8xf32>
    %c3_58 = arith.constant 3 : index
    %c2_59 = arith.constant 2 : index
    %c2_60 = arith.constant 2 : index
    %c0_61 = arith.constant 0 : index
    %63 = vector.load %arg7[%c3_58, %c2_59, %c2_60, %c0_61] : memref<4x5x10x8xf32, #tpu.memory_space<vmem>>, vector<1x1x8x8xf32>
    %64 = vector.shape_cast %63 : vector<1x1x8x8xf32> to vector<8x8xf32>
    %65 = vector.shape_cast %62 : vector<8x8xf32> to vector<1x1x8x8xf32>
    tpu.vector_store %arg7[%c3_58, %c2_59, %c2_60, %c0_61], %65 {strides = array<i32>} : memref<4x5x10x8xf32, #tpu.memory_space<vmem>>, vector<1x1x8x8xf32>,
    %66 = vector.extract_strided_slice %7 {offsets = [112, 0], sizes = [8, 8], strides = [1, 1]} : vector<128x8xf32> to vector<8x8xf32>
    %c3_62 = arith.constant 3 : index
    %c3_63 = arith.constant 3 : index
    %c2_64 = arith.constant 2 : index
    %c0_65 = arith.constant 0 : index
    %67 = vector.load %arg7[%c3_62, %c3_63, %c2_64, %c0_65] : memref<4x5x10x8xf32, #tpu.memory_space<vmem>>, vector<1x1x8x8xf32>
    %68 = vector.shape_cast %67 : vector<1x1x8x8xf32> to vector<8x8xf32>
    %69 = vector.shape_cast %66 : vector<8x8xf32> to vector<1x1x8x8xf32>
    tpu.vector_store %arg7[%c3_62, %c3_63, %c2_64, %c0_65], %69 {strides = array<i32>} : memref<4x5x10x8xf32, #tpu.memory_space<vmem>>, vector<1x1x8x8xf32>,
    %70 = vector.extract_strided_slice %7 {offsets = [120, 0], sizes = [8, 8], strides = [1, 1]} : vector<128x8xf32> to vector<8x8xf32>
    %c3_66 = arith.constant 3 : index
    %c4_67 = arith.constant 4 : index
    %c2_68 = arith.constant 2 : index
    %c0_69 = arith.constant 0 : index
    %71 = vector.load %arg7[%c3_66, %c4_67, %c2_68, %c0_69] : memref<4x5x10x8xf32, #tpu.memory_space<vmem>>, vector<1x1x8x8xf32>
    %72 = vector.shape_cast %71 : vector<1x1x8x8xf32> to vector<8x8xf32>
    %73 = vector.shape_cast %70 : vector<8x8xf32> to vector<1x1x8x8xf32>
    tpu.vector_store %arg7[%c3_66, %c4_67, %c2_68, %c0_69], %73 {strides = array<i32>} : memref<4x5x10x8xf32, #tpu.memory_space<vmem>>, vector<1x1x8x8xf32>,
    %c3_70 = arith.constant 3 : index
    %c0_71 = arith.constant 0 : index
    %c0_72 = arith.constant 0 : index
    %c0_73 = arith.constant 0 : index
    %74 = vector.load %arg7[%c3_70, %c0_71, %c0_72, %c0_73] : memref<4x5x10x8xf32, #tpu.memory_space<vmem>>, vector<1x1x8x8xf32>
    %75 = vector.shape_cast %74 : vector<1x1x8x8xf32> to vector<8x8xf32>
    %c0_74 = arith.constant 0 : index
    %c0_75 = arith.constant 0 : index
    %76 = vector.load %arg8[%c0_74, %c0_75] : memref<32x128xf32, #tpu.memory_space<vmem>>, vector<8x8xf32>
    tpu.vector_store %arg8[%c0_74, %c0_75], %75 {strides = array<i32>} : memref<32x128xf32, #tpu.memory_space<vmem>>, vector<8x8xf32>,
    %c3_76 = arith.constant 3 : index
    %c1_77 = arith.constant 1 : index
    %c0_78 = arith.constant 0 : index
    %c0_79 = arith.constant 0 : index
    %77 = vector.load %arg7[%c3_76, %c1_77, %c0_78, %c0_79] : memref<4x5x10x8xf32, #tpu.memory_space<vmem>>, vector<1x1x8x8xf32>
    %78 = vector.shape_cast %77 : vector<1x1x8x8xf32> to vector<8x8xf32>
    %c8 = arith.constant 8 : index
    %c0_80 = arith.constant 0 : index
    %79 = vector.load %arg8[%c8, %c0_80] : memref<32x128xf32, #tpu.memory_space<vmem>>, vector<8x8xf32>
    tpu.vector_store %arg8[%c8, %c0_80], %78 {strides = array<i32>} : memref<32x128xf32, #tpu.memory_space<vmem>>, vector<8x8xf32>,
    %c3_81 = arith.constant 3 : index
    %c2_82 = arith.constant 2 : index
    %c0_83 = arith.constant 0 : index
    %c0_84 = arith.constant 0 : index
    %80 = vector.load %arg7[%c3_81, %c2_82, %c0_83, %c0_84] : memref<4x5x10x8xf32, #tpu.memory_space<vmem>>, vector<1x1x8x8xf32>
    %81 = vector.shape_cast %80 : vector<1x1x8x8xf32> to vector<8x8xf32>
    %c16 = arith.constant 16 : index
    %c0_85 = arith.constant 0 : index
    %82 = vector.load %arg8[%c16, %c0_85] : memref<32x128xf32, #tpu.memory_space<vmem>>, vector<8x8xf32>
    tpu.vector_store %arg8[%c16, %c0_85], %81 {strides = array<i32>} : memref<32x128xf32, #tpu.memory_space<vmem>>, vector<8x8xf32>,
    %c3_86 = arith.constant 3 : index
    %c3_87 = arith.constant 3 : index
    %c0_88 = arith.constant 0 : index
    %c0_89 = arith.constant 0 : index
    %83 = vector.load %arg7[%c3_86, %c3_87, %c0_88, %c0_89] : memref<4x5x10x8xf32, #tpu.memory_space<vmem>>, vector<1x1x8x8xf32>
    %84 = vector.shape_cast %83 : vector<1x1x8x8xf32> to vector<8x8xf32>
    %c24 = arith.constant 24 : index
    %c0_90 = arith.constant 0 : index
    %85 = vector.load %arg8[%c24, %c0_90] : memref<32x128xf32, #tpu.memory_space<vmem>>, vector<8x8xf32>
    tpu.vector_store %arg8[%c24, %c0_90], %84 {strides = array<i32>} : memref<32x128xf32, #tpu.memory_space<vmem>>, vector<8x8xf32>,
    %c2_91 = arith.constant 2 : index
    %c0_92 = arith.constant 0 : index
    %c0_93 = arith.constant 0 : index
    %c0_94 = arith.constant 0 : index
    %86 = vector.load %arg7[%c2_91, %c0_92, %c0_93, %c0_94] : memref<4x5x10x8xf32, #tpu.memory_space<vmem>>, vector<1x1x8x8xf32>
    %87 = vector.shape_cast %86 : vector<1x1x8x8xf32> to vector<8x8xf32>
    %c0_95 = arith.constant 0 : index
    %c8_96 = arith.constant 8 : index
    %88 = vector.load %arg8[%c0_95, %c8_96] : memref<32x128xf32, #tpu.memory_space<vmem>>, vector<8x8xf32>
    tpu.vector_store %arg8[%c0_95, %c8_96], %87 {strides = array<i32>} : memref<32x128xf32, #tpu.memory_space<vmem>>, vector<8x8xf32>,
    %c2_97 = arith.constant 2 : index
    %c1_98 = arith.constant 1 : index
    %c0_99 = arith.constant 0 : index
    %c0_100 = arith.constant 0 : index
    %89 = vector.load %arg7[%c2_97, %c1_98, %c0_99, %c0_100] : memref<4x5x10x8xf32, #tpu.memory_space<vmem>>, vector<1x1x8x8xf32>
    %90 = vector.shape_cast %89 : vector<1x1x8x8xf32> to vector<8x8xf32>
    %c8_101 = arith.constant 8 : index
    %c8_102 = arith.constant 8 : index
    %91 = vector.load %arg8[%c8_101, %c8_102] : memref<32x128xf32, #tpu.memory_space<vmem>>, vector<8x8xf32>
    tpu.vector_store %arg8[%c8_101, %c8_102], %90 {strides = array<i32>} : memref<32x128xf32, #tpu.memory_space<vmem>>, vector<8x8xf32>,
    %c2_103 = arith.constant 2 : index
    %c2_104 = arith.constant 2 : index
    %c0_105 = arith.constant 0 : index
    %c0_106 = arith.constant 0 : index
    %92 = vector.load %arg7[%c2_103, %c2_104, %c0_105, %c0_106] : memref<4x5x10x8xf32, #tpu.memory_space<vmem>>, vector<1x1x8x8xf32>
    %93 = vector.shape_cast %92 : vector<1x1x8x8xf32> to vector<8x8xf32>
    %c16_107 = arith.constant 16 : index
    %c8_108 = arith.constant 8 : index
    %94 = vector.load %arg8[%c16_107, %c8_108] : memref<32x128xf32, #tpu.memory_space<vmem>>, vector<8x8xf32>
    tpu.vector_store %arg8[%c16_107, %c8_108], %93 {strides = array<i32>} : memref<32x128xf32, #tpu.memory_space<vmem>>, vector<8x8xf32>,
    %c2_109 = arith.constant 2 : index
    %c3_110 = arith.constant 3 : index
    %c0_111 = arith.constant 0 : index
    %c0_112 = arith.constant 0 : index
    %95 = vector.load %arg7[%c2_109, %c3_110, %c0_111, %c0_112] : memref<4x5x10x8xf32, #tpu.memory_space<vmem>>, vector<1x1x8x8xf32>
    %96 = vector.shape_cast %95 : vector<1x1x8x8xf32> to vector<8x8xf32>
    %c24_113 = arith.constant 24 : index
    %c8_114 = arith.constant 8 : index
    %97 = vector.load %arg8[%c24_113, %c8_114] : memref<32x128xf32, #tpu.memory_space<vmem>>, vector<8x8xf32>
    tpu.vector_store %arg8[%c24_113, %c8_114], %96 {strides = array<i32>} : memref<32x128xf32, #tpu.memory_space<vmem>>, vector<8x8xf32>,
    %c3_115 = arith.constant 3 : index
    %c0_116 = arith.constant 0 : index
    %c2_117 = arith.constant 2 : index
    %c0_118 = arith.constant 0 : index
    %98 = vector.load %arg7[%c3_115, %c0_116, %c2_117, %c0_118] : memref<4x5x10x8xf32, #tpu.memory_space<vmem>>, vector<1x1x8x8xf32>
    %99 = vector.shape_cast %98 : vector<1x1x8x8xf32> to vector<8x8xf32>
    %c0_119 = arith.constant 0 : index
    %c16_120 = arith.constant 16 : index
    %100 = vector.load %arg8[%c0_119, %c16_120] : memref<32x128xf32, #tpu.memory_space<vmem>>, vector<8x8xf32>
    tpu.vector_store %arg8[%c0_119, %c16_120], %99 {strides = array<i32>} : memref<32x128xf32, #tpu.memory_space<vmem>>, vector<8x8xf32>,
    %c3_121 = arith.constant 3 : index
    %c1_122 = arith.constant 1 : index
    %c2_123 = arith.constant 2 : index
    %c0_124 = arith.constant 0 : index
    %101 = vector.load %arg7[%c3_121, %c1_122, %c2_123, %c0_124] : memref<4x5x10x8xf32, #tpu.memory_space<vmem>>, vector<1x1x8x8xf32>
    %102 = vector.shape_cast %101 : vector<1x1x8x8xf32> to vector<8x8xf32>
    %c8_125 = arith.constant 8 : index
    %c16_126 = arith.constant 16 : index
    %103 = vector.load %arg8[%c8_125, %c16_126] : memref<32x128xf32, #tpu.memory_space<vmem>>, vector<8x8xf32>
    tpu.vector_store %arg8[%c8_125, %c16_126], %102 {strides = array<i32>} : memref<32x128xf32, #tpu.memory_space<vmem>>, vector<8x8xf32>,
    %c3_127 = arith.constant 3 : index
    %c2_128 = arith.constant 2 : index
    %c2_129 = arith.constant 2 : index
    %c0_130 = arith.constant 0 : index
    %104 = vector.load %arg7[%c3_127, %c2_128, %c2_129, %c0_130] : memref<4x5x10x8xf32, #tpu.memory_space<vmem>>, vector<1x1x8x8xf32>
    %105 = vector.shape_cast %104 : vector<1x1x8x8xf32> to vector<8x8xf32>
    %c16_131 = arith.constant 16 : index
    %c16_132 = arith.constant 16 : index
    %106 = vector.load %arg8[%c16_131, %c16_132] : memref<32x128xf32, #tpu.memory_space<vmem>>, vector<8x8xf32>
    tpu.vector_store %arg8[%c16_131, %c16_132], %105 {strides = array<i32>} : memref<32x128xf32, #tpu.memory_space<vmem>>, vector<8x8xf32>,
    %c3_133 = arith.constant 3 : index
    %c3_134 = arith.constant 3 : index
    %c2_135 = arith.constant 2 : index
    %c0_136 = arith.constant 0 : index
    %107 = vector.load %arg7[%c3_133, %c3_134, %c2_135, %c0_136] : memref<4x5x10x8xf32, #tpu.memory_space<vmem>>, vector<1x1x8x8xf32>
    %108 = vector.shape_cast %107 : vector<1x1x8x8xf32> to vector<8x8xf32>
    %c24_137 = arith.constant 24 : index
    %c16_138 = arith.constant 16 : index
    %109 = vector.load %arg8[%c24_137, %c16_138] : memref<32x128xf32, #tpu.memory_space<vmem>>, vector<8x8xf32>
    tpu.vector_store %arg8[%c24_137, %c16_138], %108 {strides = array<i32>} : memref<32x128xf32, #tpu.memory_space<vmem>>, vector<8x8xf32>,
    %c2_139 = arith.constant 2 : index
    %c0_140 = arith.constant 0 : index
    %c2_141 = arith.constant 2 : index
    %c0_142 = arith.constant 0 : index
    %110 = vector.load %arg7[%c2_139, %c0_140, %c2_141, %c0_142] : memref<4x5x10x8xf32, #tpu.memory_space<vmem>>, vector<1x1x8x8xf32>
    %111 = vector.shape_cast %110 : vector<1x1x8x8xf32> to vector<8x8xf32>
    %c0_143 = arith.constant 0 : index
    %c24_144 = arith.constant 24 : index
    %112 = vector.load %arg8[%c0_143, %c24_144] : memref<32x128xf32, #tpu.memory_space<vmem>>, vector<8x8xf32>
    tpu.vector_store %arg8[%c0_143, %c24_144], %111 {strides = array<i32>} : memref<32x128xf32, #tpu.memory_space<vmem>>, vector<8x8xf32>,
    %c2_145 = arith.constant 2 : index
    %c1_146 = arith.constant 1 : index
    %c2_147 = arith.constant 2 : index
    %c0_148 = arith.constant 0 : index
    %113 = vector.load %arg7[%c2_145, %c1_146, %c2_147, %c0_148] : memref<4x5x10x8xf32, #tpu.memory_space<vmem>>, vector<1x1x8x8xf32>
    %114 = vector.shape_cast %113 : vector<1x1x8x8xf32> to vector<8x8xf32>
    %c8_149 = arith.constant 8 : index
    %c24_150 = arith.constant 24 : index
    %115 = vector.load %arg8[%c8_149, %c24_150] : memref<32x128xf32, #tpu.memory_space<vmem>>, vector<8x8xf32>
    tpu.vector_store %arg8[%c8_149, %c24_150], %114 {strides = array<i32>} : memref<32x128xf32, #tpu.memory_space<vmem>>, vector<8x8xf32>,
    %c2_151 = arith.constant 2 : index
    %c2_152 = arith.constant 2 : index
    %c2_153 = arith.constant 2 : index
    %c0_154 = arith.constant 0 : index
    %116 = vector.load %arg7[%c2_151, %c2_152, %c2_153, %c0_154] : memref<4x5x10x8xf32, #tpu.memory_space<vmem>>, vector<1x1x8x8xf32>
    %117 = vector.shape_cast %116 : vector<1x1x8x8xf32> to vector<8x8xf32>
    %c16_155 = arith.constant 16 : index
    %c24_156 = arith.constant 24 : index
    %118 = vector.load %arg8[%c16_155, %c24_156] : memref<32x128xf32, #tpu.memory_space<vmem>>, vector<8x8xf32>
    tpu.vector_store %arg8[%c16_155, %c24_156], %117 {strides = array<i32>} : memref<32x128xf32, #tpu.memory_space<vmem>>, vector<8x8xf32>,
    %c2_157 = arith.constant 2 : index
    %c3_158 = arith.constant 3 : index
    %c2_159 = arith.constant 2 : index
    %c0_160 = arith.constant 0 : index
    %119 = vector.load %arg7[%c2_157, %c3_158, %c2_159, %c0_160] : memref<4x5x10x8xf32, #tpu.memory_space<vmem>>, vector<1x1x8x8xf32>
    %120 = vector.shape_cast %119 : vector<1x1x8x8xf32> to vector<8x8xf32>
    %c24_161 = arith.constant 24 : index
    %c24_162 = arith.constant 24 : index
    %121 = vector.load %arg8[%c24_161, %c24_162] : memref<32x128xf32, #tpu.memory_space<vmem>>, vector<8x8xf32>
    tpu.vector_store %arg8[%c24_161, %c24_162], %120 {strides = array<i32>} : memref<32x128xf32, #tpu.memory_space<vmem>>, vector<8x8xf32>,
    %c1_163 = arith.constant 1 : index
    %c0_164 = arith.constant 0 : index
    %c0_165 = arith.constant 0 : index
    %c0_166 = arith.constant 0 : index
    %122 = vector.load %arg7[%c1_163, %c0_164, %c0_165, %c0_166] : memref<4x5x10x8xf32, #tpu.memory_space<vmem>>, vector<1x1x8x8xf32>
    %123 = vector.shape_cast %122 : vector<1x1x8x8xf32> to vector<8x8xf32>
    %c0_167 = arith.constant 0 : index
    %c32 = arith.constant 32 : index
    %124 = vector.load %arg8[%c0_167, %c32] : memref<32x128xf32, #tpu.memory_space<vmem>>, vector<8x8xf32>
    tpu.vector_store %arg8[%c0_167, %c32], %123 {strides = array<i32>} : memref<32x128xf32, #tpu.memory_space<vmem>>, vector<8x8xf32>,
    %c1_168 = arith.constant 1 : index
    %c1_169 = arith.constant 1 : index
    %c0_170 = arith.constant 0 : index
    %c0_171 = arith.constant 0 : index
    %125 = vector.load %arg7[%c1_168, %c1_169, %c0_170, %c0_171] : memref<4x5x10x8xf32, #tpu.memory_space<vmem>>, vector<1x1x8x8xf32>
    %126 = vector.shape_cast %125 : vector<1x1x8x8xf32> to vector<8x8xf32>
    %c8_172 = arith.constant 8 : index
    %c32_173 = arith.constant 32 : index
    %127 = vector.load %arg8[%c8_172, %c32_173] : memref<32x128xf32, #tpu.memory_space<vmem>>, vector<8x8xf32>
    tpu.vector_store %arg8[%c8_172, %c32_173], %126 {strides = array<i32>} : memref<32x128xf32, #tpu.memory_space<vmem>>, vector<8x8xf32>,
    %c1_174 = arith.constant 1 : index
    %c2_175 = arith.constant 2 : index
    %c0_176 = arith.constant 0 : index
    %c0_177 = arith.constant 0 : index
    %128 = vector.load %arg7[%c1_174, %c2_175, %c0_176, %c0_177] : memref<4x5x10x8xf32, #tpu.memory_space<vmem>>, vector<1x1x8x8xf32>
    %129 = vector.shape_cast %128 : vector<1x1x8x8xf32> to vector<8x8xf32>
    %c16_178 = arith.constant 16 : index
    %c32_179 = arith.constant 32 : index
    %130 = vector.load %arg8[%c16_178, %c32_179] : memref<32x128xf32, #tpu.memory_space<vmem>>, vector<8x8xf32>
    tpu.vector_store %arg8[%c16_178, %c32_179], %129 {strides = array<i32>} : memref<32x128xf32, #tpu.memory_space<vmem>>, vector<8x8xf32>,
    %c1_180 = arith.constant 1 : index
    %c3_181 = arith.constant 3 : index
    %c0_182 = arith.constant 0 : index
    %c0_183 = arith.constant 0 : index
    %131 = vector.load %arg7[%c1_180, %c3_181, %c0_182, %c0_183] : memref<4x5x10x8xf32, #tpu.memory_space<vmem>>, vector<1x1x8x8xf32>
    %132 = vector.shape_cast %131 : vector<1x1x8x8xf32> to vector<8x8xf32>
    %c24_184 = arith.constant 24 : index
    %c32_185 = arith.constant 32 : index
    %133 = vector.load %arg8[%c24_184, %c32_185] : memref<32x128xf32, #tpu.memory_space<vmem>>, vector<8x8xf32>
    tpu.vector_store %arg8[%c24_184, %c32_185], %132 {strides = array<i32>} : memref<32x128xf32, #tpu.memory_space<vmem>>, vector<8x8xf32>,
    %c0_186 = arith.constant 0 : index
    %c0_187 = arith.constant 0 : index
    %c0_188 = arith.constant 0 : index
    %c0_189 = arith.constant 0 : index
    %134 = vector.load %arg7[%c0_186, %c0_187, %c0_188, %c0_189] : memref<4x5x10x8xf32, #tpu.memory_space<vmem>>, vector<1x1x8x8xf32>
    %135 = vector.shape_cast %134 : vector<1x1x8x8xf32> to vector<8x8xf32>
    %c0_190 = arith.constant 0 : index
    %c40 = arith.constant 40 : index
    %136 = vector.load %arg8[%c0_190, %c40] : memref<32x128xf32, #tpu.memory_space<vmem>>, vector<8x8xf32>
    tpu.vector_store %arg8[%c0_190, %c40], %135 {strides = array<i32>} : memref<32x128xf32, #tpu.memory_space<vmem>>, vector<8x8xf32>,
    %c0_191 = arith.constant 0 : index
    %c1_192 = arith.constant 1 : index
    %c0_193 = arith.constant 0 : index
    %c0_194 = arith.constant 0 : index
    %137 = vector.load %arg7[%c0_191, %c1_192, %c0_193, %c0_194] : memref<4x5x10x8xf32, #tpu.memory_space<vmem>>, vector<1x1x8x8xf32>
    %138 = vector.shape_cast %137 : vector<1x1x8x8xf32> to vector<8x8xf32>
    %c8_195 = arith.constant 8 : index
    %c40_196 = arith.constant 40 : index
    %139 = vector.load %arg8[%c8_195, %c40_196] : memref<32x128xf32, #tpu.memory_space<vmem>>, vector<8x8xf32>
    tpu.vector_store %arg8[%c8_195, %c40_196], %138 {strides = array<i32>} : memref<32x128xf32, #tpu.memory_space<vmem>>, vector<8x8xf32>,
    %c0_197 = arith.constant 0 : index
    %c2_198 = arith.constant 2 : index
    %c0_199 = arith.constant 0 : index
    %c0_200 = arith.constant 0 : index
    %140 = vector.load %arg7[%c0_197, %c2_198, %c0_199, %c0_200] : memref<4x5x10x8xf32, #tpu.memory_space<vmem>>, vector<1x1x8x8xf32>
    %141 = vector.shape_cast %140 : vector<1x1x8x8xf32> to vector<8x8xf32>
    %c16_201 = arith.constant 16 : index
    %c40_202 = arith.constant 40 : index
    %142 = vector.load %arg8[%c16_201, %c40_202] : memref<32x128xf32, #tpu.memory_space<vmem>>, vector<8x8xf32>
    tpu.vector_store %arg8[%c16_201, %c40_202], %141 {strides = array<i32>} : memref<32x128xf32, #tpu.memory_space<vmem>>, vector<8x8xf32>,
    %c0_203 = arith.constant 0 : index
    %c3_204 = arith.constant 3 : index
    %c0_205 = arith.constant 0 : index
    %c0_206 = arith.constant 0 : index
    %143 = vector.load %arg7[%c0_203, %c3_204, %c0_205, %c0_206] : memref<4x5x10x8xf32, #tpu.memory_space<vmem>>, vector<1x1x8x8xf32>
    %144 = vector.shape_cast %143 : vector<1x1x8x8xf32> to vector<8x8xf32>
    %c24_207 = arith.constant 24 : index
    %c40_208 = arith.constant 40 : index
    %145 = vector.load %arg8[%c24_207, %c40_208] : memref<32x128xf32, #tpu.memory_space<vmem>>, vector<8x8xf32>
    tpu.vector_store %arg8[%c24_207, %c40_208], %144 {strides = array<i32>} : memref<32x128xf32, #tpu.memory_space<vmem>>, vector<8x8xf32>,
    %c1_209 = arith.constant 1 : index
    %c0_210 = arith.constant 0 : index
    %c2_211 = arith.constant 2 : index
    %c0_212 = arith.constant 0 : index
    %146 = vector.load %arg7[%c1_209, %c0_210, %c2_211, %c0_212] : memref<4x5x10x8xf32, #tpu.memory_space<vmem>>, vector<1x1x8x8xf32>
    %147 = vector.shape_cast %146 : vector<1x1x8x8xf32> to vector<8x8xf32>
    %c0_213 = arith.constant 0 : index
    %c48 = arith.constant 48 : index
    %148 = vector.load %arg8[%c0_213, %c48] : memref<32x128xf32, #tpu.memory_space<vmem>>, vector<8x8xf32>
    tpu.vector_store %arg8[%c0_213, %c48], %147 {strides = array<i32>} : memref<32x128xf32, #tpu.memory_space<vmem>>, vector<8x8xf32>,
    %c1_214 = arith.constant 1 : index
    %c1_215 = arith.constant 1 : index
    %c2_216 = arith.constant 2 : index
    %c0_217 = arith.constant 0 : index
    %149 = vector.load %arg7[%c1_214, %c1_215, %c2_216, %c0_217] : memref<4x5x10x8xf32, #tpu.memory_space<vmem>>, vector<1x1x8x8xf32>
    %150 = vector.shape_cast %149 : vector<1x1x8x8xf32> to vector<8x8xf32>
    %c8_218 = arith.constant 8 : index
    %c48_219 = arith.constant 48 : index
    %151 = vector.load %arg8[%c8_218, %c48_219] : memref<32x128xf32, #tpu.memory_space<vmem>>, vector<8x8xf32>
    tpu.vector_store %arg8[%c8_218, %c48_219], %150 {strides = array<i32>} : memref<32x128xf32, #tpu.memory_space<vmem>>, vector<8x8xf32>,
    %c1_220 = arith.constant 1 : index
    %c2_221 = arith.constant 2 : index
    %c2_222 = arith.constant 2 : index
    %c0_223 = arith.constant 0 : index
    %152 = vector.load %arg7[%c1_220, %c2_221, %c2_222, %c0_223] : memref<4x5x10x8xf32, #tpu.memory_space<vmem>>, vector<1x1x8x8xf32>
    %153 = vector.shape_cast %152 : vector<1x1x8x8xf32> to vector<8x8xf32>
    %c16_224 = arith.constant 16 : index
    %c48_225 = arith.constant 48 : index
    %154 = vector.load %arg8[%c16_224, %c48_225] : memref<32x128xf32, #tpu.memory_space<vmem>>, vector<8x8xf32>
    tpu.vector_store %arg8[%c16_224, %c48_225], %153 {strides = array<i32>} : memref<32x128xf32, #tpu.memory_space<vmem>>, vector<8x8xf32>,
    %c1_226 = arith.constant 1 : index
    %c3_227 = arith.constant 3 : index
    %c2_228 = arith.constant 2 : index
    %c0_229 = arith.constant 0 : index
    %155 = vector.load %arg7[%c1_226, %c3_227, %c2_228, %c0_229] : memref<4x5x10x8xf32, #tpu.memory_space<vmem>>, vector<1x1x8x8xf32>
    %156 = vector.shape_cast %155 : vector<1x1x8x8xf32> to vector<8x8xf32>
    %c24_230 = arith.constant 24 : index
    %c48_231 = arith.constant 48 : index
    %157 = vector.load %arg8[%c24_230, %c48_231] : memref<32x128xf32, #tpu.memory_space<vmem>>, vector<8x8xf32>
    tpu.vector_store %arg8[%c24_230, %c48_231], %156 {strides = array<i32>} : memref<32x128xf32, #tpu.memory_space<vmem>>, vector<8x8xf32>,
    %c0_232 = arith.constant 0 : index
    %c0_233 = arith.constant 0 : index
    %c2_234 = arith.constant 2 : index
    %c0_235 = arith.constant 0 : index
    %158 = vector.load %arg7[%c0_232, %c0_233, %c2_234, %c0_235] : memref<4x5x10x8xf32, #tpu.memory_space<vmem>>, vector<1x1x8x8xf32>
    %159 = vector.shape_cast %158 : vector<1x1x8x8xf32> to vector<8x8xf32>
    %c0_236 = arith.constant 0 : index
    %c56 = arith.constant 56 : index
    %160 = vector.load %arg8[%c0_236, %c56] : memref<32x128xf32, #tpu.memory_space<vmem>>, vector<8x8xf32>
    tpu.vector_store %arg8[%c0_236, %c56], %159 {strides = array<i32>} : memref<32x128xf32, #tpu.memory_space<vmem>>, vector<8x8xf32>,
    %c0_237 = arith.constant 0 : index
    %c1_238 = arith.constant 1 : index
    %c2_239 = arith.constant 2 : index
    %c0_240 = arith.constant 0 : index
    %161 = vector.load %arg7[%c0_237, %c1_238, %c2_239, %c0_240] : memref<4x5x10x8xf32, #tpu.memory_space<vmem>>, vector<1x1x8x8xf32>
    %162 = vector.shape_cast %161 : vector<1x1x8x8xf32> to vector<8x8xf32>
    %c8_241 = arith.constant 8 : index
    %c56_242 = arith.constant 56 : index
    %163 = vector.load %arg8[%c8_241, %c56_242] : memref<32x128xf32, #tpu.memory_space<vmem>>, vector<8x8xf32>
    tpu.vector_store %arg8[%c8_241, %c56_242], %162 {strides = array<i32>} : memref<32x128xf32, #tpu.memory_space<vmem>>, vector<8x8xf32>,
    %c0_243 = arith.constant 0 : index
    %c2_244 = arith.constant 2 : index
    %c2_245 = arith.constant 2 : index
    %c0_246 = arith.constant 0 : index
    %164 = vector.load %arg7[%c0_243, %c2_244, %c2_245, %c0_246] : memref<4x5x10x8xf32, #tpu.memory_space<vmem>>, vector<1x1x8x8xf32>
    %165 = vector.shape_cast %164 : vector<1x1x8x8xf32> to vector<8x8xf32>
    %c16_247 = arith.constant 16 : index
    %c56_248 = arith.constant 56 : index
    %166 = vector.load %arg8[%c16_247, %c56_248] : memref<32x128xf32, #tpu.memory_space<vmem>>, vector<8x8xf32>
    tpu.vector_store %arg8[%c16_247, %c56_248], %165 {strides = array<i32>} : memref<32x128xf32, #tpu.memory_space<vmem>>, vector<8x8xf32>,
    %c0_249 = arith.constant 0 : index
    %c3_250 = arith.constant 3 : index
    %c2_251 = arith.constant 2 : index
    %c0_252 = arith.constant 0 : index
    %167 = vector.load %arg7[%c0_249, %c3_250, %c2_251, %c0_252] : memref<4x5x10x8xf32, #tpu.memory_space<vmem>>, vector<1x1x8x8xf32>
    %168 = vector.shape_cast %167 : vector<1x1x8x8xf32> to vector<8x8xf32>
    %c24_253 = arith.constant 24 : index
    %c56_254 = arith.constant 56 : index
    %169 = vector.load %arg8[%c24_253, %c56_254] : memref<32x128xf32, #tpu.memory_space<vmem>>, vector<8x8xf32>
    tpu.vector_store %arg8[%c24_253, %c56_254], %168 {strides = array<i32>} : memref<32x128xf32, #tpu.memory_space<vmem>>, vector<8x8xf32>,
    %c3_255 = arith.constant 3 : index
    %c1_256 = arith.constant 1 : index
    %c0_257 = arith.constant 0 : index
    %c0_258 = arith.constant 0 : index
    %170 = vector.load %arg7[%c3_255, %c1_256, %c0_257, %c0_258] : memref<4x5x10x8xf32, #tpu.memory_space<vmem>>, vector<1x1x8x8xf32>
    %171 = vector.shape_cast %170 : vector<1x1x8x8xf32> to vector<8x8xf32>
    %c0_259 = arith.constant 0 : index
    %c64 = arith.constant 64 : index
    %172 = vector.load %arg8[%c0_259, %c64] : memref<32x128xf32, #tpu.memory_space<vmem>>, vector<8x8xf32>
    tpu.vector_store %arg8[%c0_259, %c64], %171 {strides = array<i32>} : memref<32x128xf32, #tpu.memory_space<vmem>>, vector<8x8xf32>,
    %c3_260 = arith.constant 3 : index
    %c2_261 = arith.constant 2 : index
    %c0_262 = arith.constant 0 : index
    %c0_263 = arith.constant 0 : index
    %173 = vector.load %arg7[%c3_260, %c2_261, %c0_262, %c0_263] : memref<4x5x10x8xf32, #tpu.memory_space<vmem>>, vector<1x1x8x8xf32>
    %174 = vector.shape_cast %173 : vector<1x1x8x8xf32> to vector<8x8xf32>
    %c8_264 = arith.constant 8 : index
    %c64_265 = arith.constant 64 : index
    %175 = vector.load %arg8[%c8_264, %c64_265] : memref<32x128xf32, #tpu.memory_space<vmem>>, vector<8x8xf32>
    tpu.vector_store %arg8[%c8_264, %c64_265], %174 {strides = array<i32>} : memref<32x128xf32, #tpu.memory_space<vmem>>, vector<8x8xf32>,
    %c3_266 = arith.constant 3 : index
    %c3_267 = arith.constant 3 : index
    %c0_268 = arith.constant 0 : index
    %c0_269 = arith.constant 0 : index
    %176 = vector.load %arg7[%c3_266, %c3_267, %c0_268, %c0_269] : memref<4x5x10x8xf32, #tpu.memory_space<vmem>>, vector<1x1x8x8xf32>
    %177 = vector.shape_cast %176 : vector<1x1x8x8xf32> to vector<8x8xf32>
    %c16_270 = arith.constant 16 : index
    %c64_271 = arith.constant 64 : index
    %178 = vector.load %arg8[%c16_270, %c64_271] : memref<32x128xf32, #tpu.memory_space<vmem>>, vector<8x8xf32>
    tpu.vector_store %arg8[%c16_270, %c64_271], %177 {strides = array<i32>} : memref<32x128xf32, #tpu.memory_space<vmem>>, vector<8x8xf32>,
    %c3_272 = arith.constant 3 : index
    %c4_273 = arith.constant 4 : index
    %c0_274 = arith.constant 0 : index
    %c0_275 = arith.constant 0 : index
    %179 = vector.load %arg7[%c3_272, %c4_273, %c0_274, %c0_275] : memref<4x5x10x8xf32, #tpu.memory_space<vmem>>, vector<1x1x8x8xf32>
    %180 = vector.shape_cast %179 : vector<1x1x8x8xf32> to vector<8x8xf32>
    %c24_276 = arith.constant 24 : index
    %c64_277 = arith.constant 64 : index
    %181 = vector.load %arg8[%c24_276, %c64_277] : memref<32x128xf32, #tpu.memory_space<vmem>>, vector<8x8xf32>
    tpu.vector_store %arg8[%c24_276, %c64_277], %180 {strides = array<i32>} : memref<32x128xf32, #tpu.memory_space<vmem>>, vector<8x8xf32>,
    %c2_278 = arith.constant 2 : index
    %c1_279 = arith.constant 1 : index
    %c0_280 = arith.constant 0 : index
    %c0_281 = arith.constant 0 : index
    %182 = vector.load %arg7[%c2_278, %c1_279, %c0_280, %c0_281] : memref<4x5x10x8xf32, #tpu.memory_space<vmem>>, vector<1x1x8x8xf32>
    %183 = vector.shape_cast %182 : vector<1x1x8x8xf32> to vector<8x8xf32>
    %c0_282 = arith.constant 0 : index
    %c72 = arith.constant 72 : index
    %184 = vector.load %arg8[%c0_282, %c72] : memref<32x128xf32, #tpu.memory_space<vmem>>, vector<8x8xf32>
    tpu.vector_store %arg8[%c0_282, %c72], %183 {strides = array<i32>} : memref<32x128xf32, #tpu.memory_space<vmem>>, vector<8x8xf32>,
    %c2_283 = arith.constant 2 : index
    %c2_284 = arith.constant 2 : index
    %c0_285 = arith.constant 0 : index
    %c0_286 = arith.constant 0 : index
    %185 = vector.load %arg7[%c2_283, %c2_284, %c0_285, %c0_286] : memref<4x5x10x8xf32, #tpu.memory_space<vmem>>, vector<1x1x8x8xf32>
    %186 = vector.shape_cast %185 : vector<1x1x8x8xf32> to vector<8x8xf32>
    %c8_287 = arith.constant 8 : index
    %c72_288 = arith.constant 72 : index
    %187 = vector.load %arg8[%c8_287, %c72_288] : memref<32x128xf32, #tpu.memory_space<vmem>>, vector<8x8xf32>
    tpu.vector_store %arg8[%c8_287, %c72_288], %186 {strides = array<i32>} : memref<32x128xf32, #tpu.memory_space<vmem>>, vector<8x8xf32>,
    %c2_289 = arith.constant 2 : index
    %c3_290 = arith.constant 3 : index
    %c0_291 = arith.constant 0 : index
    %c0_292 = arith.constant 0 : index
    %188 = vector.load %arg7[%c2_289, %c3_290, %c0_291, %c0_292] : memref<4x5x10x8xf32, #tpu.memory_space<vmem>>, vector<1x1x8x8xf32>
    %189 = vector.shape_cast %188 : vector<1x1x8x8xf32> to vector<8x8xf32>
    %c16_293 = arith.constant 16 : index
    %c72_294 = arith.constant 72 : index
    %190 = vector.load %arg8[%c16_293, %c72_294] : memref<32x128xf32, #tpu.memory_space<vmem>>, vector<8x8xf32>
    tpu.vector_store %arg8[%c16_293, %c72_294], %189 {strides = array<i32>} : memref<32x128xf32, #tpu.memory_space<vmem>>, vector<8x8xf32>,
    %c2_295 = arith.constant 2 : index
    %c4_296 = arith.constant 4 : index
    %c0_297 = arith.constant 0 : index
    %c0_298 = arith.constant 0 : index
    %191 = vector.load %arg7[%c2_295, %c4_296, %c0_297, %c0_298] : memref<4x5x10x8xf32, #tpu.memory_space<vmem>>, vector<1x1x8x8xf32>
    %192 = vector.shape_cast %191 : vector<1x1x8x8xf32> to vector<8x8xf32>
    %c24_299 = arith.constant 24 : index
    %c72_300 = arith.constant 72 : index
    %193 = vector.load %arg8[%c24_299, %c72_300] : memref<32x128xf32, #tpu.memory_space<vmem>>, vector<8x8xf32>
    tpu.vector_store %arg8[%c24_299, %c72_300], %192 {strides = array<i32>} : memref<32x128xf32, #tpu.memory_space<vmem>>, vector<8x8xf32>,
    %c3_301 = arith.constant 3 : index
    %c1_302 = arith.constant 1 : index
    %c2_303 = arith.constant 2 : index
    %c0_304 = arith.constant 0 : index
    %194 = vector.load %arg7[%c3_301, %c1_302, %c2_303, %c0_304] : memref<4x5x10x8xf32, #tpu.memory_space<vmem>>, vector<1x1x8x8xf32>
    %195 = vector.shape_cast %194 : vector<1x1x8x8xf32> to vector<8x8xf32>
    %c0_305 = arith.constant 0 : index
    %c80 = arith.constant 80 : index
    %196 = vector.load %arg8[%c0_305, %c80] : memref<32x128xf32, #tpu.memory_space<vmem>>, vector<8x8xf32>
    tpu.vector_store %arg8[%c0_305, %c80], %195 {strides = array<i32>} : memref<32x128xf32, #tpu.memory_space<vmem>>, vector<8x8xf32>,
    %c3_306 = arith.constant 3 : index
    %c2_307 = arith.constant 2 : index
    %c2_308 = arith.constant 2 : index
    %c0_309 = arith.constant 0 : index
    %197 = vector.load %arg7[%c3_306, %c2_307, %c2_308, %c0_309] : memref<4x5x10x8xf32, #tpu.memory_space<vmem>>, vector<1x1x8x8xf32>
    %198 = vector.shape_cast %197 : vector<1x1x8x8xf32> to vector<8x8xf32>
    %c8_310 = arith.constant 8 : index
    %c80_311 = arith.constant 80 : index
    %199 = vector.load %arg8[%c8_310, %c80_311] : memref<32x128xf32, #tpu.memory_space<vmem>>, vector<8x8xf32>
    tpu.vector_store %arg8[%c8_310, %c80_311], %198 {strides = array<i32>} : memref<32x128xf32, #tpu.memory_space<vmem>>, vector<8x8xf32>,
    %c3_312 = arith.constant 3 : index
    %c3_313 = arith.constant 3 : index
    %c2_314 = arith.constant 2 : index
    %c0_315 = arith.constant 0 : index
    %200 = vector.load %arg7[%c3_312, %c3_313, %c2_314, %c0_315] : memref<4x5x10x8xf32, #tpu.memory_space<vmem>>, vector<1x1x8x8xf32>
    %201 = vector.shape_cast %200 : vector<1x1x8x8xf32> to vector<8x8xf32>
    %c16_316 = arith.constant 16 : index
    %c80_317 = arith.constant 80 : index
    %202 = vector.load %arg8[%c16_316, %c80_317] : memref<32x128xf32, #tpu.memory_space<vmem>>, vector<8x8xf32>
    tpu.vector_store %arg8[%c16_316, %c80_317], %201 {strides = array<i32>} : memref<32x128xf32, #tpu.memory_space<vmem>>, vector<8x8xf32>,
    %c3_318 = arith.constant 3 : index
    %c4_319 = arith.constant 4 : index
    %c2_320 = arith.constant 2 : index
    %c0_321 = arith.constant 0 : index
    %203 = vector.load %arg7[%c3_318, %c4_319, %c2_320, %c0_321] : memref<4x5x10x8xf32, #tpu.memory_space<vmem>>, vector<1x1x8x8xf32>
    %204 = vector.shape_cast %203 : vector<1x1x8x8xf32> to vector<8x8xf32>
    %c24_322 = arith.constant 24 : index
    %c80_323 = arith.constant 80 : index
    %205 = vector.load %arg8[%c24_322, %c80_323] : memref<32x128xf32, #tpu.memory_space<vmem>>, vector<8x8xf32>
    tpu.vector_store %arg8[%c24_322, %c80_323], %204 {strides = array<i32>} : memref<32x128xf32, #tpu.memory_space<vmem>>, vector<8x8xf32>,
    %c2_324 = arith.constant 2 : index
    %c1_325 = arith.constant 1 : index
    %c2_326 = arith.constant 2 : index
    %c0_327 = arith.constant 0 : index
    %206 = vector.load %arg7[%c2_324, %c1_325, %c2_326, %c0_327] : memref<4x5x10x8xf32, #tpu.memory_space<vmem>>, vector<1x1x8x8xf32>
    %207 = vector.shape_cast %206 : vector<1x1x8x8xf32> to vector<8x8xf32>
    %c0_328 = arith.constant 0 : index
    %c88 = arith.constant 88 : index
    %208 = vector.load %arg8[%c0_328, %c88] : memref<32x128xf32, #tpu.memory_space<vmem>>, vector<8x8xf32>
    tpu.vector_store %arg8[%c0_328, %c88], %207 {strides = array<i32>} : memref<32x128xf32, #tpu.memory_space<vmem>>, vector<8x8xf32>,
    %c2_329 = arith.constant 2 : index
    %c2_330 = arith.constant 2 : index
    %c2_331 = arith.constant 2 : index
    %c0_332 = arith.constant 0 : index
    %209 = vector.load %arg7[%c2_329, %c2_330, %c2_331, %c0_332] : memref<4x5x10x8xf32, #tpu.memory_space<vmem>>, vector<1x1x8x8xf32>
    %210 = vector.shape_cast %209 : vector<1x1x8x8xf32> to vector<8x8xf32>
    %c8_333 = arith.constant 8 : index
    %c88_334 = arith.constant 88 : index
    %211 = vector.load %arg8[%c8_333, %c88_334] : memref<32x128xf32, #tpu.memory_space<vmem>>, vector<8x8xf32>
    tpu.vector_store %arg8[%c8_333, %c88_334], %210 {strides = array<i32>} : memref<32x128xf32, #tpu.memory_space<vmem>>, vector<8x8xf32>,
    %c2_335 = arith.constant 2 : index
    %c3_336 = arith.constant 3 : index
    %c2_337 = arith.constant 2 : index
    %c0_338 = arith.constant 0 : index
    %212 = vector.load %arg7[%c2_335, %c3_336, %c2_337, %c0_338] : memref<4x5x10x8xf32, #tpu.memory_space<vmem>>, vector<1x1x8x8xf32>
    %213 = vector.shape_cast %212 : vector<1x1x8x8xf32> to vector<8x8xf32>
    %c16_339 = arith.constant 16 : index
    %c88_340 = arith.constant 88 : index
    %214 = vector.load %arg8[%c16_339, %c88_340] : memref<32x128xf32, #tpu.memory_space<vmem>>, vector<8x8xf32>
    tpu.vector_store %arg8[%c16_339, %c88_340], %213 {strides = array<i32>} : memref<32x128xf32, #tpu.memory_space<vmem>>, vector<8x8xf32>,
    %c2_341 = arith.constant 2 : index
    %c4_342 = arith.constant 4 : index
    %c2_343 = arith.constant 2 : index
    %c0_344 = arith.constant 0 : index
    %215 = vector.load %arg7[%c2_341, %c4_342, %c2_343, %c0_344] : memref<4x5x10x8xf32, #tpu.memory_space<vmem>>, vector<1x1x8x8xf32>
    %216 = vector.shape_cast %215 : vector<1x1x8x8xf32> to vector<8x8xf32>
    %c24_345 = arith.constant 24 : index
    %c88_346 = arith.constant 88 : index
    %217 = vector.load %arg8[%c24_345, %c88_346] : memref<32x128xf32, #tpu.memory_space<vmem>>, vector<8x8xf32>
    tpu.vector_store %arg8[%c24_345, %c88_346], %216 {strides = array<i32>} : memref<32x128xf32, #tpu.memory_space<vmem>>, vector<8x8xf32>,
    %c1_347 = arith.constant 1 : index
    %c1_348 = arith.constant 1 : index
    %c0_349 = arith.constant 0 : index
    %c0_350 = arith.constant 0 : index
    %218 = vector.load %arg7[%c1_347, %c1_348, %c0_349, %c0_350] : memref<4x5x10x8xf32, #tpu.memory_space<vmem>>, vector<1x1x8x8xf32>
    %219 = vector.shape_cast %218 : vector<1x1x8x8xf32> to vector<8x8xf32>
    %c0_351 = arith.constant 0 : index
    %c96 = arith.constant 96 : index
    %220 = vector.load %arg8[%c0_351, %c96] : memref<32x128xf32, #tpu.memory_space<vmem>>, vector<8x8xf32>
    tpu.vector_store %arg8[%c0_351, %c96], %219 {strides = array<i32>} : memref<32x128xf32, #tpu.memory_space<vmem>>, vector<8x8xf32>,
    %c1_352 = arith.constant 1 : index
    %c2_353 = arith.constant 2 : index
    %c0_354 = arith.constant 0 : index
    %c0_355 = arith.constant 0 : index
    %221 = vector.load %arg7[%c1_352, %c2_353, %c0_354, %c0_355] : memref<4x5x10x8xf32, #tpu.memory_space<vmem>>, vector<1x1x8x8xf32>
    %222 = vector.shape_cast %221 : vector<1x1x8x8xf32> to vector<8x8xf32>
    %c8_356 = arith.constant 8 : index
    %c96_357 = arith.constant 96 : index
    %223 = vector.load %arg8[%c8_356, %c96_357] : memref<32x128xf32, #tpu.memory_space<vmem>>, vector<8x8xf32>
    tpu.vector_store %arg8[%c8_356, %c96_357], %222 {strides = array<i32>} : memref<32x128xf32, #tpu.memory_space<vmem>>, vector<8x8xf32>,
    %c1_358 = arith.constant 1 : index
    %c3_359 = arith.constant 3 : index
    %c0_360 = arith.constant 0 : index
    %c0_361 = arith.constant 0 : index
    %224 = vector.load %arg7[%c1_358, %c3_359, %c0_360, %c0_361] : memref<4x5x10x8xf32, #tpu.memory_space<vmem>>, vector<1x1x8x8xf32>
    %225 = vector.shape_cast %224 : vector<1x1x8x8xf32> to vector<8x8xf32>
    %c16_362 = arith.constant 16 : index
    %c96_363 = arith.constant 96 : index
    %226 = vector.load %arg8[%c16_362, %c96_363] : memref<32x128xf32, #tpu.memory_space<vmem>>, vector<8x8xf32>
    tpu.vector_store %arg8[%c16_362, %c96_363], %225 {strides = array<i32>} : memref<32x128xf32, #tpu.memory_space<vmem>>, vector<8x8xf32>,
    %c1_364 = arith.constant 1 : index
    %c4_365 = arith.constant 4 : index
    %c0_366 = arith.constant 0 : index
    %c0_367 = arith.constant 0 : index
    %227 = vector.load %arg7[%c1_364, %c4_365, %c0_366, %c0_367] : memref<4x5x10x8xf32, #tpu.memory_space<vmem>>, vector<1x1x8x8xf32>
    %228 = vector.shape_cast %227 : vector<1x1x8x8xf32> to vector<8x8xf32>
    %c24_368 = arith.constant 24 : index
    %c96_369 = arith.constant 96 : index
    %229 = vector.load %arg8[%c24_368, %c96_369] : memref<32x128xf32, #tpu.memory_space<vmem>>, vector<8x8xf32>
    tpu.vector_store %arg8[%c24_368, %c96_369], %228 {strides = array<i32>} : memref<32x128xf32, #tpu.memory_space<vmem>>, vector<8x8xf32>,
    %c0_370 = arith.constant 0 : index
    %c1_371 = arith.constant 1 : index
    %c0_372 = arith.constant 0 : index
    %c0_373 = arith.constant 0 : index
    %230 = vector.load %arg7[%c0_370, %c1_371, %c0_372, %c0_373] : memref<4x5x10x8xf32, #tpu.memory_space<vmem>>, vector<1x1x8x8xf32>
    %231 = vector.shape_cast %230 : vector<1x1x8x8xf32> to vector<8x8xf32>
    %c0_374 = arith.constant 0 : index
    %c104 = arith.constant 104 : index
    %232 = vector.load %arg8[%c0_374, %c104] : memref<32x128xf32, #tpu.memory_space<vmem>>, vector<8x8xf32>
    tpu.vector_store %arg8[%c0_374, %c104], %231 {strides = array<i32>} : memref<32x128xf32, #tpu.memory_space<vmem>>, vector<8x8xf32>,
    %c0_375 = arith.constant 0 : index
    %c2_376 = arith.constant 2 : index
    %c0_377 = arith.constant 0 : index
    %c0_378 = arith.constant 0 : index
    %233 = vector.load %arg7[%c0_375, %c2_376, %c0_377, %c0_378] : memref<4x5x10x8xf32, #tpu.memory_space<vmem>>, vector<1x1x8x8xf32>
    %234 = vector.shape_cast %233 : vector<1x1x8x8xf32> to vector<8x8xf32>
    %c8_379 = arith.constant 8 : index
    %c104_380 = arith.constant 104 : index
    %235 = vector.load %arg8[%c8_379, %c104_380] : memref<32x128xf32, #tpu.memory_space<vmem>>, vector<8x8xf32>
    tpu.vector_store %arg8[%c8_379, %c104_380], %234 {strides = array<i32>} : memref<32x128xf32, #tpu.memory_space<vmem>>, vector<8x8xf32>,
    %c0_381 = arith.constant 0 : index
    %c3_382 = arith.constant 3 : index
    %c0_383 = arith.constant 0 : index
    %c0_384 = arith.constant 0 : index
    %236 = vector.load %arg7[%c0_381, %c3_382, %c0_383, %c0_384] : memref<4x5x10x8xf32, #tpu.memory_space<vmem>>, vector<1x1x8x8xf32>
    %237 = vector.shape_cast %236 : vector<1x1x8x8xf32> to vector<8x8xf32>
    %c16_385 = arith.constant 16 : index
    %c104_386 = arith.constant 104 : index
    %238 = vector.load %arg8[%c16_385, %c104_386] : memref<32x128xf32, #tpu.memory_space<vmem>>, vector<8x8xf32>
    tpu.vector_store %arg8[%c16_385, %c104_386], %237 {strides = array<i32>} : memref<32x128xf32, #tpu.memory_space<vmem>>, vector<8x8xf32>,
    %c0_387 = arith.constant 0 : index
    %c4_388 = arith.constant 4 : index
    %c0_389 = arith.constant 0 : index
    %c0_390 = arith.constant 0 : index
    %239 = vector.load %arg7[%c0_387, %c4_388, %c0_389, %c0_390] : memref<4x5x10x8xf32, #tpu.memory_space<vmem>>, vector<1x1x8x8xf32>
    %240 = vector.shape_cast %239 : vector<1x1x8x8xf32> to vector<8x8xf32>
    %c24_391 = arith.constant 24 : index
    %c104_392 = arith.constant 104 : index
    %241 = vector.load %arg8[%c24_391, %c104_392] : memref<32x128xf32, #tpu.memory_space<vmem>>, vector<8x8xf32>
    tpu.vector_store %arg8[%c24_391, %c104_392], %240 {strides = array<i32>} : memref<32x128xf32, #tpu.memory_space<vmem>>, vector<8x8xf32>,
    %c1_393 = arith.constant 1 : index
    %c1_394 = arith.constant 1 : index
    %c2_395 = arith.constant 2 : index
    %c0_396 = arith.constant 0 : index
    %242 = vector.load %arg7[%c1_393, %c1_394, %c2_395, %c0_396] : memref<4x5x10x8xf32, #tpu.memory_space<vmem>>, vector<1x1x8x8xf32>
    %243 = vector.shape_cast %242 : vector<1x1x8x8xf32> to vector<8x8xf32>
    %c0_397 = arith.constant 0 : index
    %c112 = arith.constant 112 : index
    %244 = vector.load %arg8[%c0_397, %c112] : memref<32x128xf32, #tpu.memory_space<vmem>>, vector<8x8xf32>
    tpu.vector_store %arg8[%c0_397, %c112], %243 {strides = array<i32>} : memref<32x128xf32, #tpu.memory_space<vmem>>, vector<8x8xf32>,
    %c1_398 = arith.constant 1 : index
    %c2_399 = arith.constant 2 : index
    %c2_400 = arith.constant 2 : index
    %c0_401 = arith.constant 0 : index
    %245 = vector.load %arg7[%c1_398, %c2_399, %c2_400, %c0_401] : memref<4x5x10x8xf32, #tpu.memory_space<vmem>>, vector<1x1x8x8xf32>
    %246 = vector.shape_cast %245 : vector<1x1x8x8xf32> to vector<8x8xf32>
    %c8_402 = arith.constant 8 : index
    %c112_403 = arith.constant 112 : index
    %247 = vector.load %arg8[%c8_402, %c112_403] : memref<32x128xf32, #tpu.memory_space<vmem>>, vector<8x8xf32>
    tpu.vector_store %arg8[%c8_402, %c112_403], %246 {strides = array<i32>} : memref<32x128xf32, #tpu.memory_space<vmem>>, vector<8x8xf32>,
    %c1_404 = arith.constant 1 : index
    %c3_405 = arith.constant 3 : index
    %c2_406 = arith.constant 2 : index
    %c0_407 = arith.constant 0 : index
    %248 = vector.load %arg7[%c1_404, %c3_405, %c2_406, %c0_407] : memref<4x5x10x8xf32, #tpu.memory_space<vmem>>, vector<1x1x8x8xf32>
    %249 = vector.shape_cast %248 : vector<1x1x8x8xf32> to vector<8x8xf32>
    %c16_408 = arith.constant 16 : index
    %c112_409 = arith.constant 112 : index
    %250 = vector.load %arg8[%c16_408, %c112_409] : memref<32x128xf32, #tpu.memory_space<vmem>>, vector<8x8xf32>
    tpu.vector_store %arg8[%c16_408, %c112_409], %249 {strides = array<i32>} : memref<32x128xf32, #tpu.memory_space<vmem>>, vector<8x8xf32>,
    %c1_410 = arith.constant 1 : index
    %c4_411 = arith.constant 4 : index
    %c2_412 = arith.constant 2 : index
    %c0_413 = arith.constant 0 : index
    %251 = vector.load %arg7[%c1_410, %c4_411, %c2_412, %c0_413] : memref<4x5x10x8xf32, #tpu.memory_space<vmem>>, vector<1x1x8x8xf32>
    %252 = vector.shape_cast %251 : vector<1x1x8x8xf32> to vector<8x8xf32>
    %c24_414 = arith.constant 24 : index
    %c112_415 = arith.constant 112 : index
    %253 = vector.load %arg8[%c24_414, %c112_415] : memref<32x128xf32, #tpu.memory_space<vmem>>, vector<8x8xf32>
    tpu.vector_store %arg8[%c24_414, %c112_415], %252 {strides = array<i32>} : memref<32x128xf32, #tpu.memory_space<vmem>>, vector<8x8xf32>,
    %c0_416 = arith.constant 0 : index
    %c1_417 = arith.constant 1 : index
    %c2_418 = arith.constant 2 : index
    %c0_419 = arith.constant 0 : index
    %254 = vector.load %arg7[%c0_416, %c1_417, %c2_418, %c0_419] : memref<4x5x10x8xf32, #tpu.memory_space<vmem>>, vector<1x1x8x8xf32>
    %255 = vector.shape_cast %254 : vector<1x1x8x8xf32> to vector<8x8xf32>
    %c0_420 = arith.constant 0 : index
    %c120 = arith.constant 120 : index
    %256 = vector.load %arg8[%c0_420, %c120] : memref<32x128xf32, #tpu.memory_space<vmem>>, vector<8x8xf32>
    tpu.vector_store %arg8[%c0_420, %c120], %255 {strides = array<i32>} : memref<32x128xf32, #tpu.memory_space<vmem>>, vector<8x8xf32>,
    %c0_421 = arith.constant 0 : index
    %c2_422 = arith.constant 2 : index
    %c2_423 = arith.constant 2 : index
    %c0_424 = arith.constant 0 : index
    %257 = vector.load %arg7[%c0_421, %c2_422, %c2_423, %c0_424] : memref<4x5x10x8xf32, #tpu.memory_space<vmem>>, vector<1x1x8x8xf32>
    %258 = vector.shape_cast %257 : vector<1x1x8x8xf32> to vector<8x8xf32>
    %c8_425 = arith.constant 8 : index
    %c120_426 = arith.constant 120 : index
    %259 = vector.load %arg8[%c8_425, %c120_426] : memref<32x128xf32, #tpu.memory_space<vmem>>, vector<8x8xf32>
    tpu.vector_store %arg8[%c8_425, %c120_426], %258 {strides = array<i32>} : memref<32x128xf32, #tpu.memory_space<vmem>>, vector<8x8xf32>,
    %c0_427 = arith.constant 0 : index
    %c3_428 = arith.constant 3 : index
    %c2_429 = arith.constant 2 : index
    %c0_430 = arith.constant 0 : index
    %260 = vector.load %arg7[%c0_427, %c3_428, %c2_429, %c0_430] : memref<4x5x10x8xf32, #tpu.memory_space<vmem>>, vector<1x1x8x8xf32>
    %261 = vector.shape_cast %260 : vector<1x1x8x8xf32> to vector<8x8xf32>
    %c16_431 = arith.constant 16 : index
    %c120_432 = arith.constant 120 : index
    %262 = vector.load %arg8[%c16_431, %c120_432] : memref<32x128xf32, #tpu.memory_space<vmem>>, vector<8x8xf32>
    tpu.vector_store %arg8[%c16_431, %c120_432], %261 {strides = array<i32>} : memref<32x128xf32, #tpu.memory_space<vmem>>, vector<8x8xf32>,
    %c0_433 = arith.constant 0 : index
    %c4_434 = arith.constant 4 : index
    %c2_435 = arith.constant 2 : index
    %c0_436 = arith.constant 0 : index
    %263 = vector.load %arg7[%c0_433, %c4_434, %c2_435, %c0_436] : memref<4x5x10x8xf32, #tpu.memory_space<vmem>>, vector<1x1x8x8xf32>
    %264 = vector.shape_cast %263 : vector<1x1x8x8xf32> to vector<8x8xf32>
    %c24_437 = arith.constant 24 : index
    %c120_438 = arith.constant 120 : index
    %265 = vector.load %arg8[%c24_437, %c120_438] : memref<32x128xf32, #tpu.memory_space<vmem>>, vector<8x8xf32>
    tpu.vector_store %arg8[%c24_437, %c120_438], %264 {strides = array<i32>} : memref<32x128xf32, #tpu.memory_space<vmem>>, vector<8x8xf32>,
    %c0_439 = arith.constant 0 : index
    %c0_440 = arith.constant 0 : index
    %266 = vector.load %arg8[%c0_439, %c0_440] : memref<32x128xf32, #tpu.memory_space<vmem>>, vector<32x128xf32>
    %c0_441 = arith.constant 0 : index
    %c0_442 = arith.constant 0 : index
    %267 = vector.load %arg3[%c0_441, %c0_442] : memref<128x4xf32, #tpu.memory_space<vmem>>, vector<128x4xf32>
    %cst_443 = arith.constant dense<0.000000e+00> : vector<32x4xf32>
    %268 = tpu.matmul %266, %267, %cst_443 {dimension_numbers = #tpu.dot_dimension_numbers<[1], [0], [0], [1], [0, 0, 1, 1], [], []>} : vector<32x128xf32>, vector<128x4xf32>, vector<32x4xf32> -> vector<32x4xf32>
    %cst_444 = arith.constant dense<0.000000e+00> : vector<4xf32>
    %269 = vector.multi_reduction <add>, %268, %cst_444 [0] : vector<32x4xf32> to vector<4xf32>
    %270 = vector.shape_cast %269 : vector<4xf32> to vector<1x4xf32>
    %cst_445 = arith.constant 3.200000e+01 : f32
    %271 = vector.broadcast %cst_445 : f32 to vector<1x4xf32>
    %272 = arith.divf %270, %271 : vector<1x4xf32>
    %273 = vector.broadcast %272 : vector<1x4xf32> to vector<32x4xf32>
    %274 = arith.subf %268, %273 : vector<32x4xf32>
    %275 = arith.mulf %274, %274 : vector<32x4xf32>
    %cst_446 = arith.constant dense<0.000000e+00> : vector<4xf32>
    %276 = vector.multi_reduction <add>, %275, %cst_446 [0] : vector<32x4xf32> to vector<4xf32>
    %277 = vector.shape_cast %276 : vector<4xf32> to vector<1x4xf32>
    %cst_447 = arith.constant 3.200000e+01 : f32
    %278 = vector.broadcast %cst_447 : f32 to vector<1x4xf32>
    %279 = arith.divf %277, %278 : vector<1x4xf32>
    %280 = vector.broadcast %272 : vector<1x4xf32> to vector<32x4xf32>
    %281 = arith.subf %268, %280 : vector<32x4xf32>
    %cst_448 = arith.constant 9.99999974E-6 : f32
    %282 = vector.broadcast %cst_448 : f32 to vector<1x4xf32>
    %283 = arith.addf %279, %282 : vector<1x4xf32>
    %284 = math.rsqrt %283 : vector<1x4xf32>
    %285 = vector.broadcast %284 : vector<1x4xf32> to vector<32x4xf32>
    %286 = arith.mulf %281, %285 : vector<32x4xf32>
    %c0_449 = arith.constant 0 : index
    %c0_450 = arith.constant 0 : index
    %287 = vector.load %arg5[%c0_449, %c0_450] : memref<2x4xf32, #tpu.memory_space<vmem>>, vector<1x4xf32>
    %288 = vector.broadcast %287 : vector<1x4xf32> to vector<32x4xf32>
    %289 = arith.mulf %286, %288 : vector<32x4xf32>
    %c1_451 = arith.constant 1 : index
    %c0_452 = arith.constant 0 : index
    %290 = vector.load %arg5[%c1_451, %c0_452] : memref<2x4xf32, #tpu.memory_space<vmem>>, vector<1x4xf32>
    %291 = vector.broadcast %290 : vector<1x4xf32> to vector<32x4xf32>
    %292 = arith.addf %289, %291 : vector<32x4xf32>
    %cst_453 = arith.constant 0.000000e+00 : f32
    %293 = vector.broadcast %cst_453 : f32 to vector<32x4xf32>
    %294 = arith.cmpf ogt, %292, %293 : vector<32x4xf32>
    %cst_454 = arith.constant 2.000000e-01 : f32
    %295 = vector.broadcast %cst_454 : f32 to vector<32x4xf32>
    %296 = arith.mulf %295, %292 : vector<32x4xf32>
    %297 = arith.select %294, %292, %296 : vector<32x4xi1>, vector<32x4xf32>
    %298 = vector.extract_strided_slice %297 {offsets = [0, 0], sizes = [2, 4], strides = [1, 1]} : vector<32x4xf32> to vector<2x4xf32>
    %c0_455 = arith.constant 0 : index
    %c0_456 = arith.constant 0 : index
    %299 = vector.load %arg9[%c0_455, %c0_456] : memref<2x64xf32, #tpu.memory_space<vmem>>, vector<2x4xf32>
    tpu.vector_store %arg9[%c0_455, %c0_456], %298 {strides = array<i32>} : memref<2x64xf32, #tpu.memory_space<vmem>>, vector<2x4xf32>,
    %300 = vector.extract_strided_slice %297 {offsets = [2, 0], sizes = [2, 4], strides = [1, 1]} : vector<32x4xf32> to vector<2x4xf32>
    %c0_457 = arith.constant 0 : index
    %c4_458 = arith.constant 4 : index
    %301 = vector.load %arg9[%c0_457, %c4_458] : memref<2x64xf32, #tpu.memory_space<vmem>>, vector<2x4xf32>
    tpu.vector_store %arg9[%c0_457, %c4_458], %300 {strides = array<i32>} : memref<2x64xf32, #tpu.memory_space<vmem>>, vector<2x4xf32>,
    %302 = vector.extract_strided_slice %297 {offsets = [4, 0], sizes = [2, 4], strides = [1, 1]} : vector<32x4xf32> to vector<2x4xf32>
    %c0_459 = arith.constant 0 : index
    %c8_460 = arith.constant 8 : index
    %303 = vector.load %arg9[%c0_459, %c8_460] : memref<2x64xf32, #tpu.memory_space<vmem>>, vector<2x4xf32>
    tpu.vector_store %arg9[%c0_459, %c8_460], %302 {strides = array<i32>} : memref<2x64xf32, #tpu.memory_space<vmem>>, vector<2x4xf32>,
    %304 = vector.extract_strided_slice %297 {offsets = [6, 0], sizes = [2, 4], strides = [1, 1]} : vector<32x4xf32> to vector<2x4xf32>
    %c0_461 = arith.constant 0 : index
    %c12 = arith.constant 12 : index
    %305 = vector.load %arg9[%c0_461, %c12] : memref<2x64xf32, #tpu.memory_space<vmem>>, vector<2x4xf32>
    tpu.vector_store %arg9[%c0_461, %c12], %304 {strides = array<i32>} : memref<2x64xf32, #tpu.memory_space<vmem>>, vector<2x4xf32>,
    %306 = vector.extract_strided_slice %297 {offsets = [8, 0], sizes = [2, 4], strides = [1, 1]} : vector<32x4xf32> to vector<2x4xf32>
    %c0_462 = arith.constant 0 : index
    %c16_463 = arith.constant 16 : index
    %307 = vector.load %arg9[%c0_462, %c16_463] : memref<2x64xf32, #tpu.memory_space<vmem>>, vector<2x4xf32>
    tpu.vector_store %arg9[%c0_462, %c16_463], %306 {strides = array<i32>} : memref<2x64xf32, #tpu.memory_space<vmem>>, vector<2x4xf32>,
    %308 = vector.extract_strided_slice %297 {offsets = [10, 0], sizes = [2, 4], strides = [1, 1]} : vector<32x4xf32> to vector<2x4xf32>
    %c0_464 = arith.constant 0 : index
    %c20 = arith.constant 20 : index
    %309 = vector.load %arg9[%c0_464, %c20] : memref<2x64xf32, #tpu.memory_space<vmem>>, vector<2x4xf32>
    tpu.vector_store %arg9[%c0_464, %c20], %308 {strides = array<i32>} : memref<2x64xf32, #tpu.memory_space<vmem>>, vector<2x4xf32>,
    %310 = vector.extract_strided_slice %297 {offsets = [12, 0], sizes = [2, 4], strides = [1, 1]} : vector<32x4xf32> to vector<2x4xf32>
    %c0_465 = arith.constant 0 : index
    %c24_466 = arith.constant 24 : index
    %311 = vector.load %arg9[%c0_465, %c24_466] : memref<2x64xf32, #tpu.memory_space<vmem>>, vector<2x4xf32>
    tpu.vector_store %arg9[%c0_465, %c24_466], %310 {strides = array<i32>} : memref<2x64xf32, #tpu.memory_space<vmem>>, vector<2x4xf32>,
    %312 = vector.extract_strided_slice %297 {offsets = [14, 0], sizes = [2, 4], strides = [1, 1]} : vector<32x4xf32> to vector<2x4xf32>
    %c0_467 = arith.constant 0 : index
    %c28 = arith.constant 28 : index
    %313 = vector.load %arg9[%c0_467, %c28] : memref<2x64xf32, #tpu.memory_space<vmem>>, vector<2x4xf32>
    tpu.vector_store %arg9[%c0_467, %c28], %312 {strides = array<i32>} : memref<2x64xf32, #tpu.memory_space<vmem>>, vector<2x4xf32>,
    %314 = vector.extract_strided_slice %297 {offsets = [16, 0], sizes = [2, 4], strides = [1, 1]} : vector<32x4xf32> to vector<2x4xf32>
    %c0_468 = arith.constant 0 : index
    %c32_469 = arith.constant 32 : index
    %315 = vector.load %arg9[%c0_468, %c32_469] : memref<2x64xf32, #tpu.memory_space<vmem>>, vector<2x4xf32>
    tpu.vector_store %arg9[%c0_468, %c32_469], %314 {strides = array<i32>} : memref<2x64xf32, #tpu.memory_space<vmem>>, vector<2x4xf32>,
    %316 = vector.extract_strided_slice %297 {offsets = [18, 0], sizes = [2, 4], strides = [1, 1]} : vector<32x4xf32> to vector<2x4xf32>
    %c0_470 = arith.constant 0 : index
    %c36 = arith.constant 36 : index
    %317 = vector.load %arg9[%c0_470, %c36] : memref<2x64xf32, #tpu.memory_space<vmem>>, vector<2x4xf32>
    tpu.vector_store %arg9[%c0_470, %c36], %316 {strides = array<i32>} : memref<2x64xf32, #tpu.memory_space<vmem>>, vector<2x4xf32>,
    %318 = vector.extract_strided_slice %297 {offsets = [20, 0], sizes = [2, 4], strides = [1, 1]} : vector<32x4xf32> to vector<2x4xf32>
    %c0_471 = arith.constant 0 : index
    %c40_472 = arith.constant 40 : index
    %319 = vector.load %arg9[%c0_471, %c40_472] : memref<2x64xf32, #tpu.memory_space<vmem>>, vector<2x4xf32>
    tpu.vector_store %arg9[%c0_471, %c40_472], %318 {strides = array<i32>} : memref<2x64xf32, #tpu.memory_space<vmem>>, vector<2x4xf32>,
    %320 = vector.extract_strided_slice %297 {offsets = [22, 0], sizes = [2, 4], strides = [1, 1]} : vector<32x4xf32> to vector<2x4xf32>
    %c0_473 = arith.constant 0 : index
    %c44 = arith.constant 44 : index
    %321 = vector.load %arg9[%c0_473, %c44] : memref<2x64xf32, #tpu.memory_space<vmem>>, vector<2x4xf32>
    tpu.vector_store %arg9[%c0_473, %c44], %320 {strides = array<i32>} : memref<2x64xf32, #tpu.memory_space<vmem>>, vector<2x4xf32>,
    %322 = vector.extract_strided_slice %297 {offsets = [24, 0], sizes = [2, 4], strides = [1, 1]} : vector<32x4xf32> to vector<2x4xf32>
    %c0_474 = arith.constant 0 : index
    %c48_475 = arith.constant 48 : index
    %323 = vector.load %arg9[%c0_474, %c48_475] : memref<2x64xf32, #tpu.memory_space<vmem>>, vector<2x4xf32>
    tpu.vector_store %arg9[%c0_474, %c48_475], %322 {strides = array<i32>} : memref<2x64xf32, #tpu.memory_space<vmem>>, vector<2x4xf32>,
    %324 = vector.extract_strided_slice %297 {offsets = [26, 0], sizes = [2, 4], strides = [1, 1]} : vector<32x4xf32> to vector<2x4xf32>
    %c0_476 = arith.constant 0 : index
    %c52 = arith.constant 52 : index
    %325 = vector.load %arg9[%c0_476, %c52] : memref<2x64xf32, #tpu.memory_space<vmem>>, vector<2x4xf32>
    tpu.vector_store %arg9[%c0_476, %c52], %324 {strides = array<i32>} : memref<2x64xf32, #tpu.memory_space<vmem>>, vector<2x4xf32>,
    %326 = vector.extract_strided_slice %297 {offsets = [28, 0], sizes = [2, 4], strides = [1, 1]} : vector<32x4xf32> to vector<2x4xf32>
    %c0_477 = arith.constant 0 : index
    %c56_478 = arith.constant 56 : index
    %327 = vector.load %arg9[%c0_477, %c56_478] : memref<2x64xf32, #tpu.memory_space<vmem>>, vector<2x4xf32>
    tpu.vector_store %arg9[%c0_477, %c56_478], %326 {strides = array<i32>} : memref<2x64xf32, #tpu.memory_space<vmem>>, vector<2x4xf32>,
    %328 = vector.extract_strided_slice %297 {offsets = [30, 0], sizes = [2, 4], strides = [1, 1]} : vector<32x4xf32> to vector<2x4xf32>
    %c0_479 = arith.constant 0 : index
    %c60 = arith.constant 60 : index
    %329 = vector.load %arg9[%c0_479, %c60] : memref<2x64xf32, #tpu.memory_space<vmem>>, vector<2x4xf32>
    tpu.vector_store %arg9[%c0_479, %c60], %328 {strides = array<i32>} : memref<2x64xf32, #tpu.memory_space<vmem>>, vector<2x4xf32>,
    %c0_480 = arith.constant 0 : index
    %c0_481 = arith.constant 0 : index
    %330 = vector.load %arg9[%c0_480, %c0_481] : memref<2x64xf32, #tpu.memory_space<vmem>>, vector<2x64xf32>
    %c0_482 = arith.constant 0 : index
    %c0_483 = arith.constant 0 : index
    %331 = vector.load %arg4[%c0_482, %c0_483] : memref<64x128xf32, #tpu.memory_space<vmem>>, vector<64x128xf32>
    %cst_484 = arith.constant dense<0.000000e+00> : vector<2x128xf32>
    %332 = tpu.matmul %330, %331, %cst_484 {dimension_numbers = #tpu.dot_dimension_numbers<[1], [0], [0], [1], [0, 0, 1, 1], [], []>} : vector<2x64xf32>, vector<64x128xf32>, vector<2x128xf32> -> vector<2x128xf32>
    %c0_485 = arith.constant 0 : index
    %c0_486 = arith.constant 0 : index
    %333 = vector.load %arg6[%c0_485, %c0_486] : memref<2x128xf32, #tpu.memory_space<vmem>>, vector<2x128xf32>
    tpu.vector_store %arg6[%c0_485, %c0_486], %332 {strides = array<i32>} : memref<2x128xf32, #tpu.memory_space<vmem>>, vector<2x128xf32>,
    return
  }
  func.func @transform_0(%arg0: i32) -> (i32, i32) {
    %c0_i32 = arith.constant 0 : i32
    %c0_i32_0 = arith.constant 0 : i32
    %c0_i32_1 = arith.constant 0 : i32
    return %c0_i32, %c0_i32_0 : i32, i32
  }
  func.func @transform_1(%arg0: i32) -> (i32, i32) {
    %c0_i32 = arith.constant 0 : i32
    %c0_i32_0 = arith.constant 0 : i32
    %c0_i32_1 = arith.constant 0 : i32
    return %c0_i32, %c0_i32_0 : i32, i32
  }
  func.func @transform_2(%arg0: i32) -> (i32, i32) {
    %c0_i32 = arith.constant 0 : i32
    %c0_i32_0 = arith.constant 0 : i32
    %c0_i32_1 = arith.constant 0 : i32
    return %c0_i32, %c0_i32_0 : i32, i32
  }
  func.func @transform_3(%arg0: i32) -> (i32, i32) {
    %c0_i32 = arith.constant 0 : i32
    %c0_i32_0 = arith.constant 0 : i32
    %c0_i32_1 = arith.constant 0 : i32
    return %c0_i32, %c0_i32_0 : i32, i32
  }
  func.func @transform_4(%arg0: i32) -> (i32, i32) {
    %c0_i32 = arith.constant 0 : i32
    %c0_i32_0 = arith.constant 0 : i32
    %c0_i32_1 = arith.constant 0 : i32
    return %c0_i32, %c0_i32_0 : i32, i32
  }
  func.func @transform_5(%arg0: i32) -> (i32, i32) {
    %c0_i32 = arith.constant 0 : i32
    %c0_i32_0 = arith.constant 0 : i32
    %c0_i32_1 = arith.constant 0 : i32
    return %c0_i32, %c0_i32_0 : i32, i32
  }
}

</mosaic_0001>

<bundles_post_ra>
// kernel: net_rs_forward.1
= control target key start
LH: loop header
LB: loop body
LE: loop exit
PB: predicated region body
PF: predicated region fallthrough
CT: control target
= control target key end

     0   :  { %s1568_s0 = inlined_call_operand.vmem [shape: f32[128,64], index: 0, kind: input, shape index: {}]   ;;  %s1569_s1 = inlined_call_operand.vmem [shape: f32[64,8], index: 1, kind: input, shape index: {}]   ;;  %s1570_s2 = inlined_call_operand.vmem [shape: f32[128,4], index: 2, kind: input, shape index: {}]   ;;  %s1571_s3 = inlined_call_operand.vmem [shape: f32[64,128], index: 3, kind: input, shape index: {}]   ;;  %s1572_s4 = inlined_call_operand.vmem [shape: f32[2,4], index: 4, kind: input, shape index: {}]   ;;  %s1573_s5 = inlined_call_operand.hbm [shape: f32[2,128], index: 5, kind: output, shape index: {}]  }
   0x1   :  { %v44_v0 = vld [vmem:[%s1569_s1 + $0x38] sm:$0xff]  ;;  %v43_v1 = vld [vmem:[%s1569_s1 + $0x30] sm:$0xff]  ;;  %v42_v2 = vld [vmem:[%s1569_s1 + $0x28] sm:$0xff] }
   0x2   :  { %102 = vmatpush.msra.mxu0 %v44_v0  ;;  %946 = vmatpush.msra.mxu2 %v44_v0  ;;  %v41_v3 = vld [vmem:[%s1569_s1 + $0x20] sm:$0xff]  ;;  %v40_v4 = vld [vmem:[%s1569_s1 + $0x18] sm:$0xff] }
   0x3   :  { %947 = vmatpush.msra.mxu3 %v44_v0 }
   0x4   :  { %103 = vmatpush.msra.mxu0 %v43_v1  ;;  %948 = vmatpush.msra.mxu2 %v43_v1 }
   0x5   :  { %949 = vmatpush.msra.mxu3 %v43_v1 }
   0x6   :  { %104 = vmatpush.msra.mxu0 %v42_v2  ;;  %950 = vmatpush.msra.mxu2 %v42_v2 }
   0x7   :  { %951 = vmatpush.msra.mxu3 %v42_v2 }
   0x8   :  { %10 = vsyncpa [#allocation6], 0  ;;  %105 = vmatpush.msra.mxu0 %v41_v3  ;;  %952 = vmatpush.msra.mxu2 %v41_v3  ;;  %v39_v5 = vld [vmem:[%s1569_s1 + $0x10] sm:$0xff]  ;;  %v38_v6 = vld [vmem:[%s1569_s1 + $0x8] sm:$0xff]  ;;  %vm45_vm0 = vcmask 523264   ;;  %vm207_vm1 = vcmask 64512  }
   0x9   :  { %953 = vmatpush.msra.mxu3 %v41_v3  ;;  %v37_v7 = vld [vmem:[%s1569_s1] sm:$0xff]  ;;  %v27_v9 = vld [vmem:[%s1568_s0 + $0x30] sm:$0xff]  ;;  %v22_v11 = vld [vmem:[%s1568_s0 + $0x8] sm:$0xff]  ;;  %v1020_v14 = vmov 0.0   ;;  %s1021_s26 = smov 8   ;;  %vm209_vm2 = vcmask 58368  }
   0xa   :  { %106 = vmatpush.msra.mxu0 %v40_v4  ;;  %954 = vmatpush.msra.mxu2 %v40_v4  ;;  %v21_v8 = vld [vmem:[%s1568_s0] sm:$0xff]  ;;  %v31_v10 = vld [vmem:[%s1568_s0 + $0x50] sm:$0xff]  ;;  %v28_v12 = vld [vmem:[%s1568_s0 + $0x38] sm:$0xff]  ;;  %229 = vst.msk [vmem:[#allocation2 + $0xa0] sm:$0xff] %vm207_vm1, %v1020_v14  ;;  %s1022_s14 = smov 16   ;;  %s1024_s16 = smov 56  }
   0xb   :  { %955 = vmatpush.msra.mxu3 %v40_v4  ;;  %v32_v13 = vld [vmem:[%s1568_s0 + $0x58] sm:$0xff]  ;;  %208 = vst.msk [vmem:[#allocation2] sm:$0xff] %vm207_vm1, %v1020_v14  ;;  %v23_v15 = vld [vmem:[%s1568_s0 + $0x10] sm:$0xff]  ;;  %v29_v16 = vld [vmem:[%s1568_s0 + $0x40] sm:$0xff]  ;;  %s1025_s17 = smov 40   ;;  %s1026_s18 = smov 112  }
   0xc   :  { %107 = vmatpush.msra.mxu0 %v39_v5  ;;  %956 = vmatpush.msra.mxu2 %v39_v5  ;;  %211 = vst.msk [vmem:[#allocation2 + $0x10] sm:$0xff] %vm207_vm1, %v1020_v14  ;;  %v33_v17 = vld [vmem:[%s1568_s0 + $0x60] sm:$0xff]  ;;  %v24_v19 = vld [vmem:[%s1568_s0 + $0x18] sm:$0xff]  ;;  %v30_v20 = vld [vmem:[%s1568_s0 + $0x48] sm:$0xff]  ;;  %s1027_s19 = smov 96   ;;  %s1028_s20 = smov 32  }
   0xd   :  { %957 = vmatpush.msra.mxu3 %v39_v5  ;;  %213 = vst.msk [vmem:[#allocation2 + $0x20] sm:$0xff] %vm207_vm1, %v1020_v14  ;;  %v34_v21 = vld [vmem:[%s1568_s0 + $0x68] sm:$0xff]  ;;  %v25_v22 = vld [vmem:[%s1568_s0 + $0x20] sm:$0xff]  ;;  %v35_v23 = vld [vmem:[%s1568_s0 + $0x70] sm:$0xff]  ;;  %s1029_s21 = smov 88   ;;  %s1030_s22 = smov 48  }
   0xe   :  { %108 = vmatpush.msra.mxu0 %v38_v6  ;;  %958 = vmatpush.msra.mxu2 %v38_v6  ;;  %215 = vst.msk [vmem:[#allocation2 + $0x30] sm:$0xff] %vm207_vm1, %v1020_v14  ;;  %v26_v24 = vld [vmem:[%s1568_s0 + $0x28] sm:$0xff]  ;;  %v36_v26 = vld [vmem:[%s1568_s0 + $0x78] sm:$0xff]  ;;  %s1023_s0 = smov 24   ;;  %s1031_s23 = smov 72  }
   0xf   :  { %959 = vmatpush.msra.mxu3 %v38_v6  ;;  %217 = vst.msk [vmem:[#allocation2 + $0x40] sm:$0xff] %vm207_vm1, %v1020_v14  ;;  %s1032_s24 = smov 104   ;;  %s1033_s25 = smov 120  }
  0x10   :  { %109 = vmatpush.msra.mxu0 %v37_v7  ;;  %960 = vmatpush.msra.mxu2 %v37_v7  ;;  %219 = vst.msk [vmem:[#allocation2 + $0x50] sm:$0xff] %vm207_vm1, %v1020_v14  ;;  %s1034_s27 = smov 64   ;;  %s1035_s28 = smov 80  }
  0x11   :  { %929 = vmatmul.msk.f32.vlgmr.msra.gmra.mxu0 %vm45_vm0, %v21_v8  ;;  %935 = vmatmul.msk.f32.vlgmr.msra.gmra.mxu2 %vm45_vm0, %v27_v9  ;;  %v290_v18 = vld [vmem:[#allocation2 + $0xa0] sm:$0xff]  ;;  %221 = vst.msk [vmem:[#allocation2 + $0x60] sm:$0xff] %vm207_vm1, %v1020_v14 }
  0x12   :  { %961 = vmatpush.msra.mxu3 %v37_v7  ;;  %292 = vrot.lane.b32.xlu0 %v290_v18, %s1021_s26  ;;  %223 = vst.msk [vmem:[#allocation2 + $0x70] sm:$0xff] %vm207_vm1, %v1020_v14 }
  0x13   :  { %939 = vmatmul.msk.f32.vlgmr.msra.gmra.mxu3 %vm45_vm0, %v31_v10  ;;  %225 = vst.msk [vmem:[#allocation2 + $0x80] sm:$0xff] %vm207_vm1, %v1020_v14 }
  0x14   :  { %227 = vst.msk [vmem:[#allocation2 + $0x90] sm:$0xff] %vm207_vm1, %v1020_v14 }
  0x15   :  { %231 = vst.msk [vmem:[#allocation2 + $0xb0] sm:$0xff] %vm207_vm1, %v1020_v14 }
  0x16   :  { %233 = vst.msk [vmem:[#allocation2 + $0xc0] sm:$0xff] %vm207_vm1, %v1020_v14 }
  0x17   :  { %235 = vst.msk [vmem:[#allocation2 + $0xd0] sm:$0xff] %vm207_vm1, %v1020_v14 }
  0x18   :  { %237 = vst.msk [vmem:[#allocation2 + $0xe0] sm:$0xff] %vm207_vm1, %v1020_v14 }
  0x19   :  { %930 = vmatmul.msk.f32.gmra.mxu0 %vm45_vm0, %v22_v11  ;;  %936 = vmatmul.msk.f32.gmra.mxu2 %vm45_vm0, %v28_v12  ;;  %239 = vst.msk [vmem:[#allocation2 + $0xf0] sm:$0xff] %vm207_vm1, %v1020_v14 }
  0x1a   :  { %241 = vst.msk [vmem:[#allocation2 + $0x100] sm:$0xff] %vm207_vm1, %v1020_v14 }
  0x1b   :  { %940 = vmatmul.msk.f32.gmra.mxu3 %vm45_vm0, %v32_v13  ;;  %243 = vst.msk [vmem:[#allocation2 + $0x110] sm:$0xff] %vm207_vm1, %v1020_v14 }
  0x1c   :  { %245 = vst.msk [vmem:[#allocation2 + $0x120] sm:$0xff] %vm207_vm1, %v1020_v14 }
  0x1d   :  { %247 = vst.msk [vmem:[#allocation2 + $0x130] sm:$0xff] %vm207_vm1, %v1020_v14 }
  0x1e   :  { %240 = vst.msk [vmem:[#allocation2 + $0xf8] sm:$0x3] %vm209_vm2, %v1020_v14 }
  0x1f   :  { %210 = vst.msk [vmem:[#allocation2 + $0x8] sm:$0x3] %vm209_vm2, %v1020_v14 }
  0x20   :  { %212 = vst.msk [vmem:[#allocation2 + $0x18] sm:$0x3] %vm209_vm2, %v1020_v14 }
  0x21   :  { %931 = vmatmul.msk.f32.gmra.mxu0 %vm45_vm0, %v23_v15  ;;  %937 = vmatmul.msk.f32.gmra.mxu2 %vm45_vm0, %v29_v16  ;;  %214 = vst.msk [vmem:[#allocation2 + $0x28] sm:$0x3] %vm209_vm2, %v1020_v14 }
  0x22   :  { %216 = vst.msk [vmem:[#allocation2 + $0x38] sm:$0x3] %vm209_vm2, %v1020_v14 }
  0x23   :  { %941 = vmatmul.msk.f32.gmra.mxu3 %vm45_vm0, %v33_v17  ;;  %218 = vst.msk [vmem:[#allocation2 + $0x48] sm:$0x3] %vm209_vm2, %v1020_v14 }
  0x24   :  { %220 = vst.msk [vmem:[#allocation2 + $0x58] sm:$0x3] %vm209_vm2, %v1020_v14 }
  0x25   :  { %v315_v25 = vld [vmem:[#allocation2 + $0xf2] sm:$0xff]  ;;  %222 = vst.msk [vmem:[#allocation2 + $0x68] sm:$0x3] %vm209_vm2, %v1020_v14 }
  0x26   :  { %317 = vrot.lane.b32.xlu0 %v315_v25, %s1022_s14  ;;  %224 = vst.msk [vmem:[#allocation2 + $0x78] sm:$0x3] %vm209_vm2, %v1020_v14 }
  0x27   :  { %226 = vst.msk [vmem:[#allocation2 + $0x88] sm:$0x3] %vm209_vm2, %v1020_v14 }
  0x28   :  { %228 = vst.msk [vmem:[#allocation2 + $0x98] sm:$0x3] %vm209_vm2, %v1020_v14 }
  0x29   :  { %932 = vmatmul.msk.f32.gmra.mxu0 %vm45_vm0, %v24_v19  ;;  %938 = vmatmul.msk.f32.gmra.mxu2 %vm45_vm0, %v30_v20  ;;  %230 = vst.msk [vmem:[#allocation2 + $0xa8] sm:$0x3] %vm209_vm2, %v1020_v14 }
  0x2a   :  { %232 = vst.msk [vmem:[#allocation2 + $0xb8] sm:$0x3] %vm209_vm2, %v1020_v14 }
  0x2b   :  { %942 = vmatmul.msk.f32.gmra.mxu3 %vm45_vm0, %v34_v21  ;;  %234 = vst.msk [vmem:[#allocation2 + $0xc8] sm:$0x3] %vm209_vm2, %v1020_v14 }
  0x2c   :  { %236 = vst.msk [vmem:[#allocation2 + $0xd8] sm:$0x3] %vm209_vm2, %v1020_v14 }
  0x2d   :  { %238 = vst.msk [vmem:[#allocation2 + $0xe8] sm:$0x3] %vm209_vm2, %v1020_v14 }
  0x2e   :  { %242 = vst.msk [vmem:[#allocation2 + $0x108] sm:$0x3] %vm209_vm2, %v1020_v14 }
  0x2f   :  { %244 = vst.msk [vmem:[#allocation2 + $0x118] sm:$0x3] %vm209_vm2, %v1020_v14 }
  0x30   :  { %246 = vst.msk [vmem:[#allocation2 + $0x128] sm:$0x3] %vm209_vm2, %v1020_v14  ;;  %v340_v27 = vld [vmem:[#allocation2 + $0xa2] sm:$0xff] }
  0x31   :  { %933 = vmatmul.msk.f32.gmra.mxu0 %vm45_vm0, %v25_v22  ;;  %248 = vst.msk [vmem:[#allocation2 + $0x138] sm:$0x3] %vm209_vm2, %v1020_v14  ;;  %342 = vrot.lane.b32.xlu1 %v340_v27, %s1023_s0 }
  0x33   :  { %943 = vmatmul.msk.f32.gmra.mxu3 %vm45_vm0, %v35_v23 }
  0x39   :  { %934 = vmatmul.msk.f32.gmra.mxu0 %vm45_vm0, %v26_v24 }
  0x3b   :  { %944 = vmatmul.msk.f32.gmra.mxu3 %vm45_vm0, %v36_v26  ;;  %v281_v26 = vld [vmem:[#allocation2 + $0xf0] sm:$0xff] }
  0x3c   :  { %282 = vst.msk [vmem:[#allocation3] sm:$0xff] %vm207_vm1, %v281_v26  ;;  %v683_v26 = vld [vmem:[%s1570_s2 + $0x60] sm:$0xff] }
  0x84   :  { %v293_v27 = vpop.permute.xlu0 %292 }
  0x8e   :  { %v111_v28 = vpop.f32.mrf.mxu0 }
  0x8f   :  { %vm159_vm3 = vcmp.gt.f32.partialorder %v111_v28, 0.0  ;;  %v175_v29 = vmul.f32 0.2, %v111_v28 }
  0x91   :  { %v191_v30 = vsel %vm159_vm3, %v111_v28, %v175_v29 }
  0x92   :  { %249 = vst.msk [vmem:[#allocation2] sm:$0xff] %vm207_vm1, %v191_v30 }
  0x94   :  { %v129_v31 = vpop.f32.mrf.mxu2 }
  0x95   :  { %vm165_vm4 = vcmp.gt.f32.partialorder %v129_v31, 0.0  ;;  %v181_v32 = vmul.f32 0.2, %v129_v31 }
  0x96   :  { %v141_v33 = vpop.f32.mrf.mxu3  ;;  %v114_v34 = vpop.f32.mrf.mxu0 }
  0x97   :  { %v197_v35 = vsel %vm165_vm4, %v129_v31, %v181_v32  ;;  %vm169_vm5 = vcmp.gt.f32.partialorder %v141_v33, 0.0  ;;  %v185_v36 = vmul.f32 0.2, %v141_v33  ;;  %vm160_vm6 = vcmp.gt.f32.partialorder %v114_v34, 0.0 }
  0x98   :  { %261 = vst.msk [vmem:[#allocation2 + $0x72] sm:$0xff] %vm207_vm1, %v197_v35  ;;  %v176_v37 = vmul.f32 0.2, %v114_v34  ;;  %vm295_vm4 = vcmask 130112   ;;  %v318_v30 = vpop.permute.xlu0 %317 }
  0x99   :  { %v201_v38 = vsel %vm169_vm5, %v141_v33, %v185_v36  ;;  %v440_v39 = vld [vmem:[#allocation2 + $0x2] sm:$0xff]  ;;  %296 = vst.msk [vmem:[#allocation3] sm:$0xff] %vm295_vm4, %v293_v27  ;;  %vm320_vm5 = vcmask 195712  }
  0x9a   :  { %v390_v40 = vld [vmem:[#allocation2] sm:$0xff]  ;;  %269 = vst.msk [vmem:[#allocation2 + $0xd0] sm:$0xff] %vm207_vm1, %v201_v38  ;;  %442 = vrot.lane.b32.xlu0 %v440_v39, %s1024_s16  ;;  %v192_v41 = vsel %vm160_vm6, %v114_v34, %v176_v37  ;;  %vm345_vm6 = vcmask 261312  }
  0x9b   :  { %392 = vrot.lane.b32.xlu2 %v390_v40, %s1025_s17  ;;  %251 = vst.msk [vmem:[#allocation2 + $0x10] sm:$0xff] %vm207_vm1, %v192_v41 }
  0x9c   :  { %v132_v42 = vpop.f32.mrf.mxu2  ;;  %321 = vst.msk [vmem:[#allocation3] sm:$0xff] %vm320_vm5, %v318_v30  ;;  %v682_v30 = vld [vmem:[%s1570_s2 + $0x58] sm:$0xff] }
  0x9d   :  { %vm166_vm7 = vcmp.gt.f32.partialorder %v132_v42, 0.0  ;;  %v182_v43 = vmul.f32 0.2, %v132_v42 }
  0x9e   :  { %v144_v44 = vpop.f32.mrf.mxu3  ;;  %v117_v45 = vpop.f32.mrf.mxu0 }
  0x9f   :  { %v624_v46 = vld [vmem:[#allocation2 + $0x72] sm:$0xff]  ;;  %v198_v47 = vsel %vm166_vm7, %v132_v42, %v182_v43  ;;  %vm170_vm8 = vcmp.gt.f32.partialorder %v144_v44, 0.0  ;;  %v186_v48 = vmul.f32 0.2, %v144_v44  ;;  %vm161_vm9 = vcmp.gt.f32.partialorder %v117_v45, 0.0 }
  0xa0   :  { %626 = vrot.lane.b32.xlu1 %v624_v46, %s1026_s18  ;;  %263 = vst.msk [vmem:[#allocation2 + $0x82] sm:$0xff] %vm207_vm1, %v198_v47  ;;  %v177_v49 = vmul.f32 0.2, %v117_v45  ;;  %v572_v50 = vld [vmem:[#allocation2 + $0x70] sm:$0xff] }
  0xa1   :  { %v202_v51 = vsel %vm170_vm8, %v144_v44, %v186_v48  ;;  %v553_v54 = vld [vmem:[#allocation2 + $0xd2] sm:$0xff]  ;;  %vm395_vm8 = vcmask 392512  }
  0xa2   :  { %574 = vrot.lane.b32.xlu0 %v572_v50, %s1027_s19  ;;  %271 = vst.msk [vmem:[#allocation2 + $0xe0] sm:$0xff] %vm207_vm1, %v202_v51  ;;  %v193_v52 = vsel %vm161_vm9, %v117_v45, %v177_v49  ;;  %v309_v57 = vld [vmem:[#allocation2 + $0xd0] sm:$0xff]  ;;  %vm420_vm9 = vcmask 458112  }
  0xa3   :  { %380 = vrot.lane.b32.xlu2 %v572_v50, %s1028_s20  ;;  %253 = vst.msk [vmem:[#allocation2 + $0x20] sm:$0xff] %vm207_vm1, %v193_v52  ;;  %v397_v61 = vld [vmem:[#allocation2 + $0x10] sm:$0xff]  ;;  %v343_v33 = vpop.permute.xlu1 %342 }
  0xa4   :  { %v135_v56 = vpop.f32.mrf.mxu2  ;;  %v447_v4 = vld [vmem:[#allocation2 + $0x12] sm:$0xff]  ;;  %346 = vst.msk [vmem:[#allocation3] sm:$0xff] %vm345_vm6, %v343_v33 }
  0xa5   :  { %vm167_vm11 = vcmp.gt.f32.partialorder %v135_v56, 0.0  ;;  %v183_v59 = vmul.f32 0.2, %v135_v56 }
  0xa6   :  { %v147_v53 = vpop.f32.mrf.mxu3  ;;  %v120_v63 = vpop.f32.mrf.mxu0 }
  0xa7   :  { %vm171_vm10 = vcmp.gt.f32.partialorder %v147_v53, 0.0  ;;  %v187_v55 = vmul.f32 0.2, %v147_v53  ;;  %v199_v60 = vsel %vm167_vm11, %v135_v56, %v183_v59  ;;  %vm162_vm12 = vcmp.gt.f32.partialorder %v120_v63, 0.0  ;;  %v630_v2 = vld [vmem:[#allocation2 + $0x82] sm:$0xff] }
  0xa8   :  { %555 = vrot.lane.b32.xlu1 %v553_v54, %s1029_s21  ;;  %265 = vst.msk [vmem:[#allocation2 + $0xb0] sm:$0xff] %vm207_vm1, %v199_v60  ;;  %v178_v0 = vmul.f32 0.2, %v120_v63  ;;  %v384_v8 = vld [vmem:[#allocation2 + $0x80] sm:$0xff]  ;;  %vm445_vm11 = vcmask 523712  }
  0xa9   :  { %v203_v58 = vsel %vm171_vm10, %v147_v53, %v187_v55  ;;  %v559_v56 = vld [vmem:[#allocation2 + $0xe2] sm:$0xff]  ;;  %vm470_vm10 = vcmask 589312  }
  0xaa   :  { %430 = vrot.lane.b32.xlu0 %v624_v46, %s1030_s22  ;;  %273 = vst.msk [vmem:[#allocation2 + $0x102] sm:$0xff] %vm207_vm1, %v203_v58  ;;  %v194_v1 = vsel %vm162_vm12, %v120_v63, %v178_v0  ;;  %v403_v7 = vld [vmem:[#allocation2 + $0x20] sm:$0xff]  ;;  %v585_v63 = vld [vmem:[#allocation2 + $0x90] sm:$0xff]  ;;  %vm495_vm12 = vcmask 654912  }
  0xab   :  { %311 = vrot.lane.b32.xlu2 %v309_v57, %s1021_s26  ;;  %255 = vst.msk [vmem:[#allocation2 + $0x30] sm:$0xff] %vm207_vm1, %v194_v1  ;;  %v453_v17 = vld [vmem:[#allocation2 + $0x22] sm:$0xff] }
  0xac   :  { %v138_v9 = vpop.f32.mrf.mxu2  ;;  %v509_v58 = vld [vmem:[#allocation2 + $0xe0] sm:$0xff] }
  0xad   :  { %vm168_vm14 = vcmp.gt.f32.partialorder %v138_v9, 0.0  ;;  %v184_v10 = vmul.f32 0.2, %v138_v9 }
  0xae   :  { %v150_v3 = vpop.f32.mrf.mxu3  ;;  %v123_v13 = vpop.f32.mrf.mxu0 }
  0xaf   :  { %vm172_vm13 = vcmp.gt.f32.partialorder %v150_v3, 0.0  ;;  %v188_v5 = vmul.f32 0.2, %v150_v3  ;;  %v200_v12 = vsel %vm168_vm14, %v138_v9, %v184_v10  ;;  %vm163_vm15 = vcmp.gt.f32.partialorder %v123_v13, 0.0  ;;  %v540_v22 = vld [vmem:[#allocation2 + $0xb2] sm:$0xff] }
  0xb0   :  { %399 = vrot.lane.b32.xlu1 %v397_v61, %s1025_s17  ;;  %267 = vst.msk [vmem:[#allocation2 + $0xc0] sm:$0xff] %vm207_vm1, %v200_v12  ;;  %v179_v14 = vmul.f32 0.2, %v123_v13  ;;  %v297_v25 = vld [vmem:[#allocation2 + $0xb0] sm:$0xff]  ;;  %vm545_vm14 = vcmask 786112  }
  0xb1   :  { %v465_v62 = vld [vmem:[#allocation2 + $0x100] sm:$0xff]  ;;  %v204_v6 = vsel %vm172_vm13, %v150_v3, %v188_v5  ;;  %v636_v3 = vld [vmem:[#allocation2 + $0x92] sm:$0xff]  ;;  %vm520_vm13 = vcmask 720512  }
  0xb2   :  { %505 = vrot.lane.b32.xlu0 %v309_v57, %s1031_s23  ;;  %284 = vst.msk [vmem:[#allocation3 + $0x8] sm:$0xff] %vm207_vm1, %v465_v62  ;;  %v195_v15 = vsel %vm163_vm15, %v123_v13, %v179_v14  ;;  %v322_v16 = vld [vmem:[#allocation2 + $0x102] sm:$0xff]  ;;  %v409_v28 = vld [vmem:[#allocation2 + $0x30] sm:$0xff]  ;;  %vm570_vm15 = vcmask 851712  }
  0xb3   :  { %593 = vrot.lane.b32.xlu2 %v397_v61, %s1032_s24  ;;  %275 = vst.msk [vmem:[#allocation2 + $0x112] sm:$0xff] %vm207_vm1, %v204_v6  ;;  %v655_v48 = vld [vmem:[#allocation2 + $0x32] sm:$0xff]  ;;  %v611_v57 = vld [vmem:[#allocation2 + $0x40] sm:$0xff] }
  0xb4   :  { %257 = vst.msk [vmem:[#allocation2 + $0x52] sm:$0xff] %vm207_vm1, %v195_v15 }
  0xb6   :  { %v126_v18 = vpop.f32.mrf.mxu0  ;;  %v153_v19 = vpop.f32.mrf.mxu3 }
  0xb7   :  { %vm164_vm2 = vcmp.gt.f32.partialorder %v126_v18, 0.0  ;;  %v180_v20 = vmul.f32 0.2, %v126_v18  ;;  %vm173_vm3 = vcmp.gt.f32.partialorder %v153_v19, 0.0  ;;  %v189_v21 = vmul.f32 0.2, %v153_v19 }
  0xb8   :  { %632 = vrot.lane.b32.xlu1 %v630_v2, %s1026_s18  ;;  %v497_v32 = vld [vmem:[#allocation2 + $0xc0] sm:$0xff] }
  0xb9   :  { %v196_v23 = vsel %vm164_vm2, %v126_v18, %v180_v20  ;;  %v205_v24 = vsel %vm173_vm3, %v153_v19, %v189_v21  ;;  %v547_v35 = vld [vmem:[#allocation2 + $0xc2] sm:$0xff]  ;;  %vm622_vm2 = vcmask 982912   ;;  %vm596_vm3 = vcmask 917312  }
  0xba   :  { %361 = vrot.lane.b32.xlu0 %v553_v54, %s1023_s0  ;;  %v472_v11 = vld [vmem:[#allocation2 + $0x110] sm:$0xff]  ;;  %259 = vst.msk [vmem:[#allocation2 + $0x62] sm:$0xff] %vm207_vm1, %v196_v23  ;;  %v686_v23 = vld [vmem:[%s1570_s2 + $0x78] sm:$0xff] }
  0xbb   :  { %449 = vrot.lane.b32.xlu2 %v447_v4, %s1024_s16  ;;  %286 = vst.msk [vmem:[#allocation3 + $0x10] sm:$0xff] %vm207_vm1, %v472_v11  ;;  %v328_v31 = vld [vmem:[#allocation2 + $0x112] sm:$0xff]  ;;  %687 = vmatpush.msra.mxu1 %v686_v23 }
  0xbc   :  { %277 = vst.msk [vmem:[#allocation2 + $0x122] sm:$0xff] %vm207_vm1, %v205_v24  ;;  %v365_v40 = vld [vmem:[#allocation2 + $0x50] sm:$0xff] }
  0xbd   :  { %v415_v42 = vld [vmem:[#allocation2 + $0x52] sm:$0xff] }
  0xbe   :  { %v156_v36 = vpop.f32.mrf.mxu3  ;;  %v685_v24 = vld [vmem:[%s1570_s2 + $0x70] sm:$0xff] }
  0xbf   :  { %vm174_vm7 = vcmp.gt.f32.partialorder %v156_v36, 0.0  ;;  %v190_v37 = vmul.f32 0.2, %v156_v36  ;;  %688 = vmatpush.msra.mxu1 %v685_v24 }
  0xc0   :  { %405 = vrot.lane.b32.xlu1 %v403_v7, %s1025_s17 }
  0xc1   :  { %v206_v39 = vsel %vm174_vm7, %v156_v36, %v190_v37  ;;  %v565_v41 = vld [vmem:[#allocation2 + $0x60] sm:$0xff] }
  0xc2   :  { %644 = vrot.lane.b32.xlu0 %v447_v4, %s1033_s25  ;;  %279 = vst.msk [vmem:[#allocation2 + $0x132] sm:$0xff] %vm207_vm1, %v206_v39  ;;  %v422_v44 = vld [vmem:[#allocation2 + $0x62] sm:$0xff] }
  0xc3   :  { %386 = vrot.lane.b32.xlu2 %v384_v8, %s1028_s20  ;;  %v287_v29 = vld [vmem:[#allocation2 + $0x120] sm:$0xff] }
  0xc4   :  { %288 = vst.msk [vmem:[#allocation3 + $0x18] sm:$0xff] %vm207_vm1, %v287_v29  ;;  %v528_v45 = vld [vmem:[#allocation2 + $0x122] sm:$0xff]  ;;  %vm370_vm1 = vcmask 326912  }
  0xc5   :  { %v661_v4 = vld [vmem:[#allocation2 + $0x42] sm:$0xff] }
  0xc6   :  { %v679_v36 = vld [vmem:[%s1570_s2 + $0x40] sm:$0xff] }
  0xc8   :  { %467 = vrot.lane.b32.xlu1 %v465_v62, %s1034_s27 }
  0xc9   :  { %v534_v52 = vld [vmem:[#allocation2 + $0x132] sm:$0xff] }
  0xca   :  { %580 = vrot.lane.b32.xlu0 %v384_v8, %s1027_s19  ;;  %v484_v62 = vld [vmem:[#allocation2 + $0x130] sm:$0xff] }
  0xcb   :  { %600 = vrot.lane.b32.xlu2 %v403_v7, %s1032_s24 }
  0xd0   :  { %324 = vrot.lane.b32.xlu1 %v322_v16, %s1022_s14 }
  0xd2   :  { %436 = vrot.lane.b32.xlu0 %v630_v2, %s1030_s22 }
  0xd3   :  { %455 = vrot.lane.b32.xlu2 %v453_v17, %s1024_s16 }
  0xd8   :  { %542 = vrot.lane.b32.xlu1 %v540_v22, %s1029_s21 }
  0xda   :  { %651 = vrot.lane.b32.xlu0 %v453_v17, %s1033_s25 }
  0xdb   :  { %299 = vrot.lane.b32.xlu2 %v297_v25, %s1021_s26 }
  0xe0   :  { %411 = vrot.lane.b32.xlu1 %v409_v28, %s1025_s17 }
  0xe2   :  { %492 = vrot.lane.b32.xlu0 %v297_v25, %s1031_s23  ;;  %v684_v25 = vld [vmem:[%s1570_s2 + $0x68] sm:$0xff] }
  0xe3   :  { %517 = vrot.lane.b32.xlu2 %v322_v16, %s1035_s28  ;;  %689 = vmatpush.msra.mxu1 %v684_v25 }
  0xe5   :  { %690 = vmatpush.msra.mxu1 %v683_v26 }
  0xe7   :  { %691 = vmatpush.msra.mxu1 %v682_v30 }
  0xe8   :  { %474 = vrot.lane.b32.xlu1 %v472_v11, %s1034_s27 }
  0xea   :  { %349 = vrot.lane.b32.xlu0 %v540_v22, %s1023_s0 }
  0xeb   :  { %606 = vrot.lane.b32.xlu2 %v409_v28, %s1032_s24 }
  0xf0   :  { %330 = vrot.lane.b32.xlu1 %v328_v31, %s1022_s14 }
  0xf2   :  { %499 = vrot.lane.b32.xlu0 %v497_v32, %s1031_s23 }
  0xf3   :  { %305 = vrot.lane.b32.xlu2 %v497_v32, %s1021_s26  ;;  %v680_v32 = vld [vmem:[%s1570_s2 + $0x48] sm:$0xff] }
  0xf5   :  { %v1304_v34 = vpop.permute.xlu2 %392 }
  0xf8   :  { %549 = vrot.lane.b32.xlu1 %v547_v35, %s1029_s21 }
  0xfa   :  { %355 = vrot.lane.b32.xlu0 %v547_v35, %s1023_s0 }
  0xfb   :  { %524 = vrot.lane.b32.xlu2 %v328_v31, %s1035_s28  ;;  %v681_v31 = vld [vmem:[%s1570_s2 + $0x50] sm:$0xff] }
  0xfc   :  { %692 = vmatpush.msra.mxu1 %v681_v31 }
  0xfd   :  { %v1309_v38 = vpop.permute.xlu2 %380 }
  0xfe   :  { %693 = vmatpush.msra.mxu1 %v680_v32 }
 0x100   :  { %367 = vrot.lane.b32.xlu1 %v365_v40, %s1028_s20  ;;  %694 = vmatpush.msra.mxu1 %v679_v36  ;;  %v678_v40 = vld [vmem:[%s1570_s2 + $0x38] sm:$0xff] }
 0x102   :  { %567 = vrot.lane.b32.xlu0 %v565_v41, %s1027_s19  ;;  %695 = vmatpush.msra.mxu1 %v678_v40 }
 0x103   :  { %417 = vrot.lane.b32.xlu2 %v415_v42, %s1030_s22  ;;  %v675_v42 = vld [vmem:[%s1570_s2 + $0x20] sm:$0xff] }
 0x105   :  { %v312_v43 = vpop.permute.xlu2 %311 }
 0x106   :  { %314 = vst.msk [vmem:[#allocation3 + $0x18] sm:$0xff] %vm295_vm4, %v312_v43 }
 0x108   :  { %480 = vrot.lane.b32.xlu1 %v287_v29, %s1034_s27 }
 0x10a   :  { %424 = vrot.lane.b32.xlu0 %v422_v44, %s1030_s22 }
 0x10b   :  { %530 = vrot.lane.b32.xlu2 %v528_v45, %s1035_s28 }
 0x10c   :  { %v1319_v46 = vpop.permute.xlu0 %442 }
 0x10d   :  { %v1321_v47 = vpop.permute.xlu2 %593 }
 0x110   :  { %336 = vrot.lane.b32.xlu1 %v528_v45, %s1022_s14  ;;  %v673_v45 = vld [vmem:[%s1570_s2 + $0x10] sm:$0xff] }
 0x112   :  { %v1324_v49 = vpop.permute.xlu1 %626  ;;  %657 = vrot.lane.b32.xlu0 %v655_v48, %s1033_s25 }
 0x113   :  { %374 = vrot.lane.b32.xlu2 %v565_v41, %s1028_s20  ;;  %v677_v41 = vld [vmem:[%s1570_s2 + $0x30] sm:$0xff] }
 0x114   :  { %v1328_v50 = vpop.permute.xlu0 %574  ;;  %696 = vmatpush.msra.mxu1 %v677_v41 }
 0x115   :  { %v1330_v51 = vpop.permute.xlu2 %449 }
 0x118   :  { %619 = vrot.lane.b32.xlu1 %v422_v44, %s1026_s18  ;;  %v674_v44 = vld [vmem:[%s1570_s2 + $0x18] sm:$0xff] }
 0x11a   :  { %v1333_v53 = vpop.permute.xlu1 %555  ;;  %536 = vrot.lane.b32.xlu0 %v534_v52, %s1035_s28  ;;  %v671_v52 = vld [vmem:[%s1570_s2] sm:$0xff] }
 0x11b   :  { %461 = vrot.lane.b32.xlu2 %v655_v48, %s1024_s16  ;;  %v672_v48 = vld [vmem:[%s1570_s2 + $0x8] sm:$0xff] }
 0x11c   :  { %v1337_v54 = vpop.permute.xlu0 %430 }
 0x11d   :  { %v1339_v55 = vpop.permute.xlu2 %386 }
 0x120   :  { %561 = vrot.lane.b32.xlu1 %v559_v56, %s1029_s21 }
 0x122   :  { %v1342_v59 = vpop.permute.xlu1 %399  ;;  %613 = vrot.lane.b32.xlu0 %v611_v57, %s1032_s24  ;;  %s1038_s24 = smov 4  }
 0x123   :  { %511 = vrot.lane.b32.xlu2 %v509_v58, %s1031_s23  ;;  %s1037_s23 = smov 12  }
 0x124   :  { %v1346_v60 = vpop.permute.xlu0 %505 }
 0x125   :  { %v1348_v61 = vpop.permute.xlu2 %600 }
 0x128   :  { %486 = vrot.lane.b32.xlu1 %v484_v62, %s1034_s27  ;;  %s1044_s27 = smov 52  }
 0x12a   :  { %v1351_v0 = vpop.permute.xlu1 %632 }
 0x12b   :  { %587 = vrot.lane.b32.xlu2 %v585_v63, %s1027_s19  ;;  %s920_s19 = sshll.u32 %s1573_s5, 4  ;;  %s921_s19 = int_to_ptr.hbm [resolvable:$true] %s920_s19 }
 0x12c   :  { %v1354_v1 = vpop.permute.xlu0 %361 }
 0x12d   :  { %v1356_v2 = vpop.permute.xlu2 %455 }
 0x130   :  { %638 = vrot.lane.b32.xlu1 %v636_v3, %s1026_s18  ;;  %v1036_v3 = vmov 32.0  }
 0x131   :  { %990 = vrcp.f32 %v1036_v3 }
 0x132   :  { %v406_v5 = vpop.permute.xlu1 %405 }
 0x133   :  { %663 = vrot.lane.b32.xlu2 %v661_v4, %s1033_s25  ;;  %s1041_s25 = smov 28  }
 0x134   :  { %v1360_v6 = vpop.permute.xlu0 %644 }
 0x135   :  { %v300_v7 = vpop.permute.xlu2 %299 }
 0x136   :  { %302 = vst.msk [vmem:[#allocation3 + $0x8] sm:$0xff] %vm295_vm4, %v300_v7 }
 0x13a   :  { %v1363_v8 = vpop.permute.xlu1 %467 }
 0x13c   :  { %v1365_v9 = vpop.permute.xlu0 %580 }
 0x13d   :  { %v1367_v10 = vpop.permute.xlu2 %517 }
 0x142   :  { %v325_v11 = vpop.permute.xlu1 %324 }
 0x143   :  { %327 = vst.msk [vmem:[#allocation3 + $0x8] sm:$0xff] %vm320_vm5, %v325_v11 }
 0x144   :  { %v1370_v12 = vpop.permute.xlu0 %436 }
 0x145   :  { %v1372_v13 = vpop.permute.xlu2 %606 }
 0x14a   :  { %v1374_v14 = vpop.permute.xlu1 %542 }
 0x14c   :  { %v1376_v15 = vpop.permute.xlu0 %651 }
 0x14d   :  { %v306_v16 = vpop.permute.xlu2 %305 }
 0x14e   :  { %308 = vst.msk [vmem:[#allocation3 + $0x10] sm:$0xff] %vm295_vm4, %v306_v16  ;;  %vm647_vm4 = vcmask 1048512  }
 0x152   :  { %v1379_v17 = vpop.permute.xlu1 %411 }
 0x154   :  { %v493_v18 = vpop.permute.xlu0 %492 }
 0x155   :  { %v1381_v19 = vpop.permute.xlu2 %524 }
 0x15a   :  { %v1383_v20 = vpop.permute.xlu1 %474 }
 0x15c   :  { %v350_v21 = vpop.permute.xlu0 %349 }
 0x15d   :  { %v418_v22 = vpop.permute.xlu2 %417  ;;  %352 = vst.msk [vmem:[#allocation3 + $0x8] sm:$0xff] %vm345_vm6, %v350_v21 }
 0x162   :  { %v331_v27 = vpop.permute.xlu1 %330 }
 0x163   :  { %333 = vst.msk [vmem:[#allocation3 + $0x10] sm:$0xff] %vm320_vm5, %v331_v27 }
 0x164   :  { %v1399_v28 = vpop.permute.xlu0 %499 }
 0x165   :  { %v531_v29 = vpop.permute.xlu2 %530 }
 0x16a   :  { %v1410_v33 = vpop.permute.xlu1 %549 }
 0x16c   :  { %v356_v35 = vpop.permute.xlu0 %355 }
 0x16d   :  { %358 = vst.msk [vmem:[#allocation3 + $0x10] sm:$0xff] %vm345_vm6, %v356_v35  ;;  %v375_v37 = vpop.permute.xlu2 %374 }
 0x16e   :  { %383 = vst.msk [vmem:[#allocation3 + $0x10] sm:$0xff] %vm370_vm1, %v1309_v38 }
 0x16f   :  { %408 = vst.msk [vmem:[#allocation3 + $0x10] sm:$0xff] %vm395_vm8, %v406_v5  ;;  %v991_v5 = vpop.eup %990 }
 0x170   :  { %377 = vst.msk [vmem:[#allocation3 + $0x8] sm:$0xff] %vm370_vm1, %v375_v37 }
 0x171   :  { %402 = vst.msk [vmem:[#allocation3 + $0x8] sm:$0xff] %vm395_vm8, %v1342_v59 }
 0x172   :  { %v368_v39 = vpop.permute.xlu1 %367  ;;  %433 = vst.msk [vmem:[#allocation3 + $0x10] sm:$0xff] %vm420_vm9, %v1337_v54 }
 0x173   :  { %371 = vst.msk [vmem:[#allocation3] sm:$0xff] %vm370_vm1, %v368_v39 }
 0x174   :  { %396 = vst.msk [vmem:[#allocation3] sm:$0xff] %vm395_vm8, %v1304_v34  ;;  %v568_v38 = vpop.permute.xlu0 %567  ;;  %v676_v34 = vld [vmem:[%s1570_s2 + $0x28] sm:$0xff] }
 0x175   :  { %421 = vst.msk [vmem:[#allocation3] sm:$0xff] %vm420_vm9, %v418_v22  ;;  %697 = vmatpush.msra.mxu1 %v676_v34 }
 0x176   :  { %446 = vst.msk [vmem:[#allocation3] sm:$0xff] %vm445_vm11, %v1319_v46 }
 0x177   :  { %471 = vst.msk [vmem:[#allocation3] sm:$0xff] %vm470_vm10, %v1363_v8  ;;  %698 = vmatpush.msra.mxu1 %v675_v42 }
 0x178   :  { %496 = vst.msk [vmem:[#allocation3] sm:$0xff] %vm495_vm12, %v493_v18 }
 0x179   :  { %521 = vst.msk [vmem:[#allocation3] sm:$0xff] %vm520_vm13, %v1367_v10  ;;  %699 = vmatpush.msra.mxu1 %v674_v44 }
 0x17a   :  { %546 = vst.msk [vmem:[#allocation3] sm:$0xff] %vm545_vm14, %v1374_v14  ;;  %v481_v43 = vpop.permute.xlu1 %480 }
 0x17b   :  { %571 = vst.msk [vmem:[#allocation3] sm:$0xff] %vm570_vm15, %v568_v38  ;;  %700 = vmatpush.msra.mxu1 %v673_v45 }
 0x17c   :  { %458 = vst.msk [vmem:[#allocation3 + $0x10] sm:$0xff] %vm445_vm11, %v1356_v2  ;;  %v425_v46 = vpop.permute.xlu0 %424 }
 0x17d   :  { %483 = vst.msk [vmem:[#allocation3 + $0x10] sm:$0xff] %vm470_vm10, %v481_v43  ;;  %701 = vmatpush.msra.mxu1 %v672_v48 }
 0x17e   :  { %508 = vst.msk [vmem:[#allocation3 + $0x10] sm:$0xff] %vm495_vm12, %v1346_v60 }
 0x17f   :  { %533 = vst.msk [vmem:[#allocation3 + $0x10] sm:$0xff] %vm520_vm13, %v531_v29  ;;  %702 = vmatpush.msra.mxu1 %v671_v52 }
 0x180   :  { %558 = vst.msk [vmem:[#allocation3 + $0x10] sm:$0xff] %vm545_vm14, %v1333_v53  ;;  %v462_v53 = vpop.permute.xlu2 %461 }
 0x181   :  { %583 = vst.msk [vmem:[#allocation3 + $0x10] sm:$0xff] %vm570_vm15, %v1365_v9  ;;  %v731_v9 = vmul.f32 32.0, %v991_v5 }
 0x182   :  { %427 = vst.msk [vmem:[#allocation3 + $0x8] sm:$0xff] %vm420_vm9, %v425_v46  ;;  %v337_v54 = vpop.permute.xlu1 %336 }
 0x183   :  { %452 = vst.msk [vmem:[#allocation3 + $0x8] sm:$0xff] %vm445_vm11, %v1330_v51  ;;  %v732_v14 = vsub.f32 1.0, %v731_v9 }
 0x184   :  { %477 = vst.msk [vmem:[#allocation3 + $0x8] sm:$0xff] %vm470_vm10, %v1383_v20  ;;  %v658_v56 = vpop.permute.xlu0 %657 }
 0x185   :  { %502 = vst.msk [vmem:[#allocation3 + $0x8] sm:$0xff] %vm495_vm12, %v1399_v28 }
 0x186   :  { %527 = vst.msk [vmem:[#allocation3 + $0x8] sm:$0xff] %vm520_vm13, %v1381_v19 }
 0x187   :  { %552 = vst.msk [vmem:[#allocation3 + $0x8] sm:$0xff] %vm545_vm14, %v1410_v33 }
 0x188   :  { %577 = vst.msk [vmem:[#allocation3 + $0x8] sm:$0xff] %vm570_vm15, %v1328_v50  ;;  %v512_v50 = vpop.permute.xlu2 %511 }
 0x189   :  { %339 = vst.msk [vmem:[#allocation3 + $0x18] sm:$0xff] %vm320_vm5, %v337_v54  ;;  %vm716_vm5 = vcmask 31744  }
 0x18a   :  { %364 = vst.msk [vmem:[#allocation3 + $0x18] sm:$0xff] %vm345_vm6, %v1354_v1  ;;  %v620_v51 = vpop.permute.xlu1 %619  ;;  %vm735_vm6 = vweird.f32 %v991_v5 }
 0x18b   :  { %389 = vst.msk [vmem:[#allocation3 + $0x18] sm:$0xff] %vm370_vm1, %v1339_v55 }
 0x18c   :  { %414 = vst.msk [vmem:[#allocation3 + $0x18] sm:$0xff] %vm395_vm8, %v1379_v17  ;;  %v537_v57 = vpop.permute.xlu0 %536  ;;  %v733_v17 = vmul.f32 %v991_v5, %v732_v14  ;;  %v888_v14 = vld [vmem:[%s1571_s3 + $0x38] sm:$0xff] }
 0x18d   :  { %439 = vst.msk [vmem:[#allocation3 + $0x18] sm:$0xff] %vm420_vm9, %v1370_v12  ;;  %900 = vmatpush.msrb.mxu2 %v888_v14 }
 0x18e   :  { %609 = vst.msk [vmem:[#allocation3 + $0x10] sm:$0xff] %vm596_vm3, %v1372_v13  ;;  %v734_v20 = vadd.f32 %v991_v5, %v733_v17  ;;  %v885_v17 = vld [vmem:[%s1571_s3 + $0x20] sm:$0xff] }
 0x18f   :  { %635 = vst.msk [vmem:[#allocation3 + $0x10] sm:$0xff] %vm622_vm2, %v1351_v0 }
 0x190   :  { %603 = vst.msk [vmem:[#allocation3 + $0x8] sm:$0xff] %vm596_vm3, %v1348_v61  ;;  %v588_v58 = vpop.permute.xlu2 %587  ;;  %v736_v23 = vsel %vm735_vm6, %v991_v5, %v734_v20  ;;  %v883_v20 = vld [vmem:[%s1571_s3 + $0x10] sm:$0xff]  ;;  %vm836_vm6 = vcmask 261350  }
 0x191   :  { %629 = vst.msk [vmem:[#allocation3 + $0x8] sm:$0xff] %vm622_vm2, %v1324_v49 }
 0x192   :  { %654 = vst.msk [vmem:[#allocation3 + $0x8] sm:$0xff] %vm647_vm4, %v1376_v15  ;;  %v562_v55 = vpop.permute.xlu1 %561 }
 0x193   :  { %660 = vst.msk [vmem:[#allocation3 + $0x10] sm:$0xff] %vm647_vm4, %v658_v56 }
 0x194   :  { %464 = vst.msk [vmem:[#allocation3 + $0x18] sm:$0xff] %vm445_vm11, %v462_v53  ;;  %v614_v49 = vpop.permute.xlu0 %613 }
 0x195   :  { %597 = vst.msk [vmem:[#allocation3] sm:$0xff] %vm596_vm3, %v1321_v47 }
 0x196   :  { %623 = vst.msk [vmem:[#allocation3] sm:$0xff] %vm622_vm2, %v620_v51 }
 0x197   :  { %648 = vst.msk [vmem:[#allocation3] sm:$0xff] %vm647_vm4, %v1360_v6 }
 0x198   :  { %v664_v47 = vpop.permute.xlu2 %663 }
 0x199   :  { %v668_v62 = vld [vmem:[#allocation3 + $0x8] sm:$0xff] }
 0x19a   :  { %v487_v59 = vpop.permute.xlu1 %486  ;;  %v669_v63 = vld [vmem:[#allocation3 + $0x10] sm:$0xff] }
 0x19b   :  { %489 = vst.msk [vmem:[#allocation3 + $0x18] sm:$0xff] %vm470_vm10, %v487_v59  ;;  %vm799_vm10 = vcmask 25600  }
 0x19c   :  { %514 = vst.msk [vmem:[#allocation3 + $0x18] sm:$0xff] %vm495_vm12, %v512_v50 }
 0x19d   :  { %539 = vst.msk [vmem:[#allocation3 + $0x18] sm:$0xff] %vm520_vm13, %v537_v57  ;;  %v988_v57 = vld [vmem:[%s1572_s4] ss:$0 sm:$0xff] }
 0x19e   :  { %v667_v60 = vld [vmem:[#allocation3] sm:$0xff]  ;;  %564 = vst.msk [vmem:[#allocation3 + $0x18] sm:$0xff] %vm545_vm14, %v562_v55  ;;  %vm805_vm14 = vcmask 60450  }
 0x19f   :  { %703 = vmatmul.f32.vlgmr.msra.gmra.mxu1 %v667_v60  ;;  %590 = vst.msk [vmem:[#allocation3 + $0x18] sm:$0xff] %vm570_vm15, %v588_v58  ;;  %v989_v60 = vld [vmem:[%s1572_s4 + $0x1] ss:$0 sm:$0xff]  ;;  %s1039_s4 = smov 20   ;;  %vm810_vm15 = vcmask 95300  }
 0x1a0   :  { %616 = vst.msk [vmem:[#allocation3 + $0x18] sm:$0xff] %vm596_vm3, %v614_v49  ;;  %vm821_vm3 = vcmask 156800  }
 0x1a2   :  { %v639_v61 = vpop.permute.xlu1 %638 }
 0x1a3   :  { %641 = vst.msk [vmem:[#allocation3 + $0x18] sm:$0xff] %vm622_vm2, %v639_v61  ;;  %vm815_vm2 = vcmask 130150  }
 0x1a4   :  { %666 = vst.msk [vmem:[#allocation3 + $0x18] sm:$0xff] %vm647_vm4, %v664_v47  ;;  %vm826_vm4 = vcmask 191650  }
 0x1a7   :  { %706 = vmatmul.f32.gmra.mxu1 %v668_v62 }
 0x1ab   :  { %v670_v0 = vld [vmem:[#allocation3 + $0x18] sm:$0xff] }
 0x1af   :  { %709 = vmatmul.f32.gmra.mxu1 %v669_v63 }
 0x1b7   :  { %712 = vmatmul.f32.gmra.mxu1 %v670_v0 }
 0x21c   :  { %v704_v1 = vpop.f32.mrf.mxu1 }
 0x21d   :  { %v717_v7 = vsel %vm716_vm5, %v704_v1, 0.0 }
 0x224   :  { %v707_v2 = vpop.f32.mrf.mxu1 }
 0x225   :  { %v718_v6 = vsel %vm716_vm5, %v707_v2, 0.0 }
 0x226   :  { %v719_v10 = vadd.f32 %v718_v6, %v717_v7 }
 0x22c   :  { %v710_v4 = vpop.f32.mrf.mxu1 }
 0x22d   :  { %v720_v8 = vsel %vm716_vm5, %v710_v4, 0.0 }
 0x22e   :  { %v721_v11 = vadd.f32 %v720_v8, %v719_v10 }
 0x234   :  { %v713_v12 = vpop.f32.mrf.mxu1 }
 0x235   :  { %v722_v13 = vsel %vm716_vm5, %v713_v12, 0.0 }
 0x236   :  { %v723_v15 = vadd.f32 %v722_v13, %v721_v11 }
 0x238   :  { %v724_v16 = vrot.slane %v723_v15, 4 }
 0x23a   :  { %v725_v18 = vadd.f32 %v724_v16, %v723_v15  ;;  %v887_v15 = vld [vmem:[%s1571_s3 + $0x30] sm:$0xff]  ;;  %v886_v16 = vld [vmem:[%s1571_s3 + $0x28] sm:$0xff] }
 0x23b   :  { %901 = vmatpush.msrb.mxu2 %v887_v15 }
 0x23c   :  { %v726_v19 = vrot.slane %v725_v18, 2 }
 0x23d   :  { %902 = vmatpush.msrb.mxu2 %v886_v16 }
 0x23e   :  { %v727_v21 = vadd.f32 %v726_v19, %v725_v18  ;;  %v884_v19 = vld [vmem:[%s1571_s3 + $0x18] sm:$0xff] }
 0x23f   :  { %903 = vmatpush.msrb.mxu2 %v885_v17 }
 0x240   :  { %v728_v22 = vrot.slane %v727_v21, 1 }
 0x241   :  { %904 = vmatpush.msrb.mxu2 %v884_v19 }
 0x242   :  { %v729_v24 = vadd.f32 %v728_v22, %v727_v21 }
 0x243   :  { %905 = vmatpush.msrb.mxu2 %v883_v20 }
 0x244   :  { %v737_v25 = vmul.f32 %v736_v23, %v729_v24  ;;  %v881_v24 = vld [vmem:[%s1571_s3] sm:$0xff] }
 0x246   :  { %v738_v26 = vsub.f32 %v704_v1, %v737_v25  ;;  %v739_v27 = vsub.f32 %v707_v2, %v737_v25  ;;  %v740_v28 = vsub.f32 %v710_v4, %v737_v25  ;;  %v741_v29 = vsub.f32 %v713_v12, %v737_v25 }
 0x248   :  { %v742_v30 = vmul.f32 %v738_v26, %v738_v26  ;;  %v743_v31 = vmul.f32 %v739_v27, %v739_v27  ;;  %v744_v32 = vmul.f32 %v740_v28, %v740_v28  ;;  %v745_v33 = vmul.f32 %v741_v29, %v741_v29 }
 0x24a   :  { %v746_v35 = vsel %vm716_vm5, %v742_v30, 0.0  ;;  %v747_v36 = vsel %vm716_vm5, %v743_v31, 0.0  ;;  %v749_v39 = vsel %vm716_vm5, %v744_v32, 0.0  ;;  %v751_v40 = vsel %vm716_vm5, %v745_v33, 0.0 }
 0x24b   :  { %v748_v37 = vadd.f32 %v747_v36, %v746_v35  ;;  %vm831_vm5 = vcmask 226500  }
 0x24d   :  { %v750_v38 = vadd.f32 %v749_v39, %v748_v37 }
 0x24f   :  { %v752_v41 = vadd.f32 %v751_v40, %v750_v38 }
 0x251   :  { %v753_v34 = vrot.slane %v752_v41, 4 }
 0x253   :  { %v754_v42 = vadd.f32 %v753_v34, %v752_v41 }
 0x255   :  { %v755_v43 = vrot.slane %v754_v42, 2 }
 0x257   :  { %v756_v44 = vadd.f32 %v755_v43, %v754_v42 }
 0x259   :  { %v757_v45 = vrot.slane %v756_v44, 1 }
 0x25b   :  { %v758_v46 = vadd.f32 %v757_v45, %v756_v44 }
 0x25d   :  { %v759_v48 = vmul.f32 %v758_v46, %v736_v23  ;;  %v882_v23 = vld [vmem:[%s1571_s3 + $0x8] sm:$0xff]  ;;  %s1045_s3 = smov [#allocation5]  }
 0x25e   :  { %906 = vmatpush.msrb.mxu2 %v882_v23  ;;  %s918_s15 = sshll.u32 %s1045_s3, 4  ;;  %s919_s15 = int_to_ptr.vmem [resolvable:$true] %s918_s15 }
 0x25f   :  { %v760_v52 = vadd.f32 1e-05, %v759_v48 }
 0x260   :  { %907 = vmatpush.msrb.mxu2 %v881_v24 }
 0x261   :  { %992 = vrsqrt.f32 %v760_v52  ;;  %vm767_vm1 = vweird.f32 %v760_v52 }
 0x267   :  { %v993_v54 = vpop.eup %992 }
 0x268   :  { %v762_v53 = vmul.f32 %v993_v54, %v760_v52  ;;  %vm768_vm7 = vweird.f32 %v993_v54 }
 0x269   :  { %vm769_vm8 = vmor %vm767_vm1, %vm768_vm7  ;;  %vm842_vm7 = vcmask 288000   ;;  %vm847_vm1 = vcmask 322850  }
 0x26a   :  { %v763_v51 = vmul.f32 %v993_v54, %v762_v53 }
 0x26c   :  { %v764_v56 = vmul.f32 0.5, %v763_v51 }
 0x26e   :  { %v765_v50 = vsub.f32 1.5, %v764_v56 }
 0x270   :  { %v766_v55 = vmul.f32 %v993_v54, %v765_v50 }
 0x272   :  { %v770_v58 = vsel %vm769_vm8, %v993_v54, %v766_v55  ;;  %vm852_vm8 = vcmask 357700  }
 0x273   :  { %v771_v59 = vmul.f32 %v770_v58, %v738_v26  ;;  %v772_v49 = vmul.f32 %v770_v58, %v739_v27  ;;  %v773_v0 = vmul.f32 %v770_v58, %v740_v28  ;;  %v774_v5 = vmul.f32 %v770_v58, %v741_v29 }
 0x275   :  { %v777_v47 = vmul.f32 %v988_v57, %v771_v59  ;;  %v778_v62 = vmul.f32 %v988_v57, %v772_v49  ;;  %v779_v4 = vmul.f32 %v988_v57, %v773_v0  ;;  %v780_v8 = vmul.f32 %v988_v57, %v774_v5 }
 0x277   :  { %v783_v61 = vadd.f32 %v989_v60, %v777_v47  ;;  %v784_v2 = vadd.f32 %v989_v60, %v778_v62  ;;  %v785_v7 = vadd.f32 %v989_v60, %v779_v4  ;;  %v786_v10 = vadd.f32 %v989_v60, %v780_v8 }
 0x279   :  { %vm787_vm9 = vcmp.gt.f32.partialorder %v783_v61, 0.0  ;;  %v791_v63 = vmul.f32 0.2, %v783_v61  ;;  %v792_v3 = vmul.f32 0.2, %v784_v2  ;;  %vm788_vm11 = vcmp.gt.f32.partialorder %v784_v2, 0.0 }
 0x27a   :  { %v793_v9 = vmul.f32 0.2, %v785_v7  ;;  %vm789_vm12 = vcmp.gt.f32.partialorder %v785_v7, 0.0  ;;  %v794_v12 = vmul.f32 0.2, %v786_v10  ;;  %vm790_vm13 = vcmp.gt.f32.partialorder %v786_v10, 0.0 }
 0x27b   :  { %v795_v1 = vsel %vm787_vm9, %v783_v61, %v791_v63  ;;  %v796_v6 = vsel %vm788_vm11, %v784_v2, %v792_v3  ;;  %vm857_vm9 = vcmask 392550   ;;  %vm868_vm11 = vcmask 454050  }
 0x27c   :  { %812 = vrot.lane.b32.xlu2 %v795_v1, %s1037_s23  ;;  %807 = vrot.lane.b32.xlu1 %v795_v1, %s1021_s26  ;;  %800 = vst.msk [vmem:[#allocation4] sm:$0x3] %vm799_vm10, %v795_v1  ;;  %v797_v11 = vsel %vm789_vm12, %v785_v7, %v793_v9  ;;  %s1040_s26 = smov 36   ;;  %v798_v13 = vsel %vm790_vm13, %v786_v10, %v794_v12  ;;  %vm863_vm10 = vcmask 419200   ;;  %vm873_vm12 = vcmask 488900  }
 0x27d   :  { %802 = vrot.lane.b32.xlu0 %v795_v1, %s1038_s24  ;;  %vm878_vm13 = vcmask 523750  }
 0x284   :  { %828 = vrot.lane.b32.xlu2 %v796_v6, %s1023_s0  ;;  %823 = vrot.lane.b32.xlu1 %v796_v6, %s1039_s4  ;;  %s1042_s0 = smov 44  }
 0x285   :  { %818 = vrot.lane.b32.xlu0 %v796_v6, %s1022_s14  ;;  %s1043_s14 = smov 60  }
 0x28c   :  { %844 = vrot.lane.b32.xlu2 %v797_v11, %s1040_s26  ;;  %839 = vrot.lane.b32.xlu1 %v797_v11, %s1028_s20 }
 0x28d   :  { %833 = vrot.lane.b32.xlu0 %v796_v6, %s1041_s25 }
 0x294   :  { %860 = vrot.lane.b32.xlu2 %v798_v13, %s1030_s22  ;;  %854 = vrot.lane.b32.xlu1 %v797_v11, %s1042_s0 }
 0x295   :  { %849 = vrot.lane.b32.xlu0 %v797_v11, %s1025_s17 }
 0x29c   :  { %875 = vrot.lane.b32.xlu2 %v798_v13, %s1043_s14  ;;  %870 = vrot.lane.b32.xlu1 %v798_v13, %s1024_s16 }
 0x29d   :  { %865 = vrot.lane.b32.xlu0 %v798_v13, %s1044_s27 }
 0x2d6   :  { %v813_v18 = vpop.permute.xlu2 %812 }
 0x2de   :  { %v829_v25 = vpop.permute.xlu2 %828 }
 0x2e6   :  { %v845_v28 = vpop.permute.xlu2 %844 }
 0x2ee   :  { %v808_v21 = vpop.permute.xlu1 %807  ;;  %v861_v32 = vpop.permute.xlu2 %860 }
 0x2ef   :  { %v803_v22 = vpop.permute.xlu0 %802 }
 0x2f0   :  { %806 = vst.msk [vmem:[#allocation4 - $0x2] sm:$0xc] %vm805_vm14, %v803_v22 }
 0x2f1   :  { %811 = vst.msk [vmem:[#allocation4 - $0x4] sm:$0x30] %vm810_vm15, %v808_v21 }
 0x2f2   :  { %816 = vst.msk [vmem:[#allocation4 - $0x6] sm:$0xc0] %vm815_vm2, %v813_v18 }
 0x2f6   :  { %v824_v26 = vpop.permute.xlu1 %823  ;;  %v876_v37 = vpop.permute.xlu2 %875 }
 0x2f7   :  { %v819_v27 = vpop.permute.xlu0 %818 }
 0x2f8   :  { %822 = vst.msk [vmem:[#allocation4] sm:$0x3] %vm821_vm3, %v819_v27 }
 0x2f9   :  { %827 = vst.msk [vmem:[#allocation4 - $0x2] sm:$0xc] %vm826_vm4, %v824_v26 }
 0x2fa   :  { %832 = vst.msk [vmem:[#allocation4 - $0x4] sm:$0x30] %vm831_vm5, %v829_v25 }
 0x2fe   :  { %v840_v29 = vpop.permute.xlu1 %839 }
 0x2ff   :  { %v834_v30 = vpop.permute.xlu0 %833 }
 0x300   :  { %837 = vst.msk [vmem:[#allocation4 - $0x6] sm:$0xc0] %vm836_vm6, %v834_v30 }
 0x301   :  { %843 = vst.msk [vmem:[#allocation4] sm:$0x3] %vm842_vm7, %v840_v29 }
 0x302   :  { %848 = vst.msk [vmem:[#allocation4 - $0x2] sm:$0xc] %vm847_vm1, %v845_v28 }
 0x306   :  { %v855_v31 = vpop.permute.xlu1 %854 }
 0x307   :  { %v850_v33 = vpop.permute.xlu0 %849 }
 0x308   :  { %853 = vst.msk [vmem:[#allocation4 - $0x4] sm:$0x30] %vm852_vm8, %v850_v33 }
 0x309   :  { %858 = vst.msk [vmem:[#allocation4 - $0x6] sm:$0xc0] %vm857_vm9, %v855_v31 }
 0x30a   :  { %864 = vst.msk [vmem:[#allocation4] sm:$0x3] %vm863_vm10, %v861_v32 }
 0x30e   :  { %v871_v35 = vpop.permute.xlu1 %870 }
 0x30f   :  { %v866_v36 = vpop.permute.xlu0 %865 }
 0x310   :  { %869 = vst.msk [vmem:[#allocation4 - $0x2] sm:$0xc] %vm868_vm11, %v866_v36 }
 0x311   :  { %874 = vst.msk [vmem:[#allocation4 - $0x4] sm:$0x30] %vm873_vm12, %v871_v35 }
 0x312   :  { %879 = vst.msk [vmem:[#allocation4 - $0x6] sm:$0xc0] %vm878_vm13, %v876_v37 }
 0x319   :  { %v880_v39 = vld [vmem:[#allocation4] sm:$0x3] }
 0x31a   :  { %945 = vmatmul.msk.f32.vlgmr.msrb.gmra.mxu2 %vm45_vm0, %v880_v39 }
 0x39d   :  { %v909_v38 = vpop.f32.mrf.mxu2 }
 0x39e   :  { %912 = vst [vmem:[#allocation5] sm:$0x3] %v909_v38 }
 0x39f   :  { %923 = dma.vmem_to_hbm [thread:$0]  %s919_s15, 32, %s921_s19, [#allocation6]  }
 0x3a0   :  { %1018 = dma.done.wait [#allocation6], 32  }
 0x3a1   :  { %1019 = vsyncadd [#allocation6], 4294967264 }
 0x3a2   :  { %928 = vsyncpa [#allocation6], 1 }

</bundles_post_ra>
